<compile_context>
chip_gen: v7x
topology: tpu7x:2x2x1
jax: 0.10.0
libtpu: 0.0.40
codegen_flags: <defaults>
</compile_context>

<pallas_src>
import functools

import jax
import jax.numpy as jnp
import numpy as np
from jax.experimental import pallas as pl
from jax.experimental.pallas import tpu as pltpu

LANE = 128                        # feature/node dims padded to multiples of this
VMEM_BUDGET_BYTES = 64 * 1024 * 1024  # conservative: <= physical VMEM on v5e/v6e/v7x


def _ceil_to(x, m):
    return ((x + m - 1) // m) * m


def _pad2d(x, rows, cols, dtype):
    out = jnp.zeros((rows, cols), dtype)
    return out.at[:x.shape[0], :x.shape[1]].set(x.astype(dtype))


# ----------------------------------------------------------------------------
# Fused kernel: encode + all n_steps of propagation.
#   grid = (n_steps, n_etypes, n_row_tiles)          (all axes "arbitrary")
#   h is carried in VMEM: f32 in the resident output block + bf16 shadow.
#   t==0: zero acc, compute msg_all = h @ [Wlin_0|..], gh = h @ [Whr|Whz|Whn].
#   every (t,k): acc += A_t(tile) @ msg_t
#   last (t,k):  h <- GRUCell(acc, h)  (PyTorch gate order r, z, n)
# ----------------------------------------------------------------------------
def _ggnn_kernel(x_ref, wenc_ref, benc_ref, a_ref, wlin_ref, blin_ref,
                 wi_ref, wh_ref, bi_ref, bh_ref,
                 o_ref, acc_ref, hb_ref, msg_ref, gh_ref,
                 *, a_resident, m_tile):
    s = pl.program_id(0)
    t = pl.program_id(1)
    k = pl.program_id(2)
    DP = o_ref.shape[1]
    n_et = msg_ref.shape[0]

    # --- one-time: fused encoding layer  h0 = relu(x @ W_enc^T + b_enc) ---
    @pl.when((s == 0) & (t == 0) & (k == 0))
    def _():
        h0 = jnp.maximum(
            jnp.dot(x_ref[...], wenc_ref[...],
                    preferred_element_type=jnp.float32) + benc_ref[...], 0.0)
        o_ref[...] = h0                           # f32 hidden-state carry
        hb_ref[...] = h0.astype(jnp.bfloat16)     # bf16 shadow for the MXU

    # --- per-step prologue: messages for ALL edge types + hoisted gh ---
    @pl.when((t == 0) & (k == 0))
    def _():
        acc_ref[...] = jnp.zeros_like(acc_ref)
        h_b = hb_ref[...]
        # one wide matmul (DP x n_etypes*DP): fills the 256-wide MXU on v6e/v7x
        msg_all = jnp.dot(h_b, wlin_ref[...],
                          preferred_element_type=jnp.float32) + blin_ref[...]
        for e in range(n_et):                     # static unroll
            msg_ref[e] = msg_all[:, e * DP:(e + 1) * DP].astype(jnp.bfloat16)
        # GRU hidden-path gates are constant within a step: hoist them here so
        # they overlap with the A matmul / DMA pipeline.
        gh_ref[...] = jnp.dot(h_b, wh_ref[...],
                              preferred_element_type=jnp.float32) + bh_ref[...]

    # --- message aggregation over incoming edges of type t ---
    if a_resident:
        # A fully resident: (n_etypes, NP, NP) block, indexed in-kernel.
        acc_ref[...] += jnp.dot(a_ref[t], msg_ref[t],
                                preferred_element_type=jnp.float32)
    else:
        # Streamed fallback: A_t dst-row tile (m_tile, NP) per grid step.
        row = pl.multiple_of(k * m_tile, 128)
        tile = jnp.dot(a_ref[0], msg_ref[t],
                       preferred_element_type=jnp.float32)
        acc_ref[pl.ds(row, m_tile), :] += tile

    # --- per-step epilogue: GRUCell(acc, h), PyTorch gate order (r, z, n) ---
    @pl.when((t == pl.num_programs(1) - 1) & (k == pl.num_programs(2) - 1))
    def _():
        h = o_ref[...]
        a_b = acc_ref[...].astype(jnp.bfloat16)
        gi = jnp.dot(a_b, wi_ref[...],
                     preferred_element_type=jnp.float32) + bi_ref[...]
        gh = gh_ref[...]
        r = jax.nn.sigmoid(gi[:, 0 * DP:1 * DP] + gh[:, 0 * DP:1 * DP])
        z = jax.nn.sigmoid(gi[:, 1 * DP:2 * DP] + gh[:, 1 * DP:2 * DP])
        n = jnp.tanh(gi[:, 2 * DP:3 * DP] + r * gh[:, 2 * DP:3 * DP])
        h_new = (1.0 - z) * n + z * h
        o_ref[...] = h_new
        hb_ref[...] = h_new.astype(jnp.bfloat16)


def _ggnn_fused(embed_p, w_enc_p, b_enc_p, A_p, Wlin_cat, blin_cat,
                wi_p, wh_p, bi_p, bh_p, n_steps):
    NP, DinP = embed_p.shape
    DP = w_enc_p.shape[1]
    n_etypes = A_p.shape[0]

    def nbytes(shape, dtype):
        return int(np.prod(shape)) * jnp.dtype(dtype).itemsize

    # everything except the A block (double-buffer-conservative x2 applied later)
    fixed = (nbytes((NP, DinP), jnp.bfloat16) +
             nbytes((DinP, DP), jnp.bfloat16) +
             nbytes((1, DP), jnp.float32) +
             nbytes((DP, n_etypes * DP), jnp.bfloat16) +
             nbytes((1, n_etypes * DP), jnp.float32) +
             2 * nbytes((DP, 3 * DP), jnp.bfloat16) +
             2 * nbytes((1, 3 * DP), jnp.float32) +
             nbytes((NP, DP), jnp.float32))
    scratch = (nbytes((NP, DP), jnp.float32) +          # acc
               nbytes((NP, DP), jnp.bfloat16) +         # hb
               nbytes((n_etypes, NP, DP), jnp.bfloat16) +  # msg
               nbytes((NP, 3 * DP), jnp.float32))       # gh

    a_full = nbytes((n_etypes, NP, NP), jnp.bfloat16)
    resident_need = 2 * (fixed + a_full) + scratch

    if resident_need <= int(0.9 * VMEM_BUDGET_BYTES):
        a_resident, m_tile, needed = True, NP, resident_need
        n_row_tiles = 1
        a_spec = pl.BlockSpec((n_etypes, NP, NP), lambda s, t, k: (0, 0, 0))
    else:
        a_resident = False
        m_tile = 128
        for cand in (2048, 1024, 512, 256, 128):
            if NP % cand == 0:
                need = 2 * (fixed + nbytes((cand, NP), jnp.bfloat16)) + scratch
                if need <= int(0.9 * VMEM_BUDGET_BYTES):
                    m_tile = cand
                    break
        needed = 2 * (fixed + nbytes((m_tile, NP), jnp.bfloat16)) + scratch
        n_row_tiles = NP // m_tile
        a_spec = pl.BlockSpec((1, m_tile, NP), lambda s, t, k: (t, k, 0))

    vmem_limit = int(min(VMEM_BUDGET_BYTES, max(32 << 20, 2 * needed + (8 << 20))))

    const2 = lambda s, t, k: (0, 0)
    kernel = functools.partial(_ggnn_kernel, a_resident=a_resident, m_tile=m_tile)

    return pl.pallas_call(
        kernel,
        out_shape=jax.ShapeDtypeStruct((NP, DP), jnp.float32),
        grid_spec=pltpu.PrefetchScalarGridSpec(
            num_scalar_prefetch=0,
            grid=(n_steps, n_etypes, n_row_tiles),
            in_specs=[
                pl.BlockSpec((NP, DinP), const2),            # x (bf16)
                pl.BlockSpec((DinP, DP), const2),            # W_enc^T (bf16)
                pl.BlockSpec((1, DP), const2),               # b_enc (f32)
                a_spec,                                      # A (bf16)
                pl.BlockSpec((DP, n_etypes * DP), const2),   # [Wlin_0|..] (bf16)
                pl.BlockSpec((1, n_etypes * DP), const2),    # [blin_0|..] (f32)
                pl.BlockSpec((DP, 3 * DP), const2),          # [Wir|Wiz|Win] (bf16)
                pl.BlockSpec((DP, 3 * DP), const2),          # [Whr|Whz|Whn] (bf16)
                pl.BlockSpec((1, 3 * DP), const2),           # [bir|biz|bin] (f32)
                pl.BlockSpec((1, 3 * DP), const2),           # [bhr|bhz|bhn] (f32)
            ],
            out_specs=pl.BlockSpec((NP, DP), const2),
            scratch_shapes=[
                pltpu.VMEM((NP, DP), jnp.float32),              # acc
                pltpu.VMEM((NP, DP), jnp.bfloat16),             # bf16 shadow of h
                pltpu.VMEM((n_etypes, NP, DP), jnp.bfloat16),   # per-etype msgs
                pltpu.VMEM((NP, 3 * DP), jnp.float32),          # hoisted gh
            ],
        ),
        compiler_params=pltpu.CompilerParams(
            dimension_semantics=("arbitrary", "arbitrary", "arbitrary"),
            vmem_limit_bytes=vmem_limit),
    )(embed_p, w_enc_p, b_enc_p, A_p, Wlin_cat, blin_cat, wi_p, wh_p, bi_p, bh_p)


# ----------------------------------------------------------------------------
# Full GGNN forward: pad/pack params, run the fused kernel, un-pad.
# ----------------------------------------------------------------------------
def ggnn_forward(embed, w_enc_t, b_enc, A, Wlin_t, blin, gru, n_steps):
    (wir, wiz, win, whr, whz, whn, bir, biz, bin_, bhr, bhz, bhn) = gru
    N, Din = embed.shape
    D = w_enc_t.shape[1]
    n_etypes = A.shape[0]

    # lane-dense padding everywhere (NP is the K dim of the big matmuls and
    # A's lane dim, so it is padded to x128 as well)
    DP = _ceil_to(D, LANE)
    DinP = _ceil_to(Din, LANE)
    NP = _ceil_to(N, LANE)

    # bf16 MXU operands, f32 biases.  Padding is exact zeros, so real outputs
    # are unchanged and sliced back out at the end.
    embed_p = _pad2d(embed, NP, DinP, jnp.bfloat16)
    w_enc_p = _pad2d(w_enc_t, DinP, DP, jnp.bfloat16)
    b_enc_p = _pad2d(b_enc.reshape(1, -1), 1, DP, jnp.float32)

    # NOTE: A is cast to bf16; integer edge multiplicities are exact up to 256
    # per (etype, dst, src).  Keep A in f32 if counts can exceed that.
    A_p = jnp.zeros((n_etypes, NP, NP), jnp.bfloat16)
    A_p = A_p.at[:, :N, :N].set(A.astype(jnp.bfloat16))

    Wlin_cat = jnp.zeros((DP, n_etypes * DP), jnp.bfloat16)
    blin_cat = jnp.zeros((1, n_etypes * DP), jnp.float32)
    for e in range(n_etypes):
        Wlin_cat = Wlin_cat.at[:D, e * DP:e * DP + D].set(
            Wlin_t[e].astype(jnp.bfloat16))
        blin_cat = blin_cat.at[:, e * DP:e * DP + D].set(blin[e])

    def pack_w(w_r, w_z, w_n):
        w = jnp.zeros((DP, 3 * DP), jnp.bfloat16)
        for g, wg in enumerate((w_r, w_z, w_n)):
            w = w.at[:D, g * DP:g * DP + D].set(wg.astype(jnp.bfloat16))
        return w

    def pack_b(b_r, b_z, b_n):
        b = jnp.zeros((1, 3 * DP), jnp.float32)
        for g, bg in enumerate((b_r, b_z, b_n)):
            b = b.at[:, g * DP:g * DP + D].set(bg)
        return b

    wi_p = pack_w(wir, wiz, win)
    wh_p = pack_w(whr, whz, whn)
    bi_p = pack_b(bir, biz, bin_)
    bh_p = pack_b(bhr, bhz, bhn)

    out_p = _ggnn_fused(embed_p, w_enc_p, b_enc_p, A_p, Wlin_cat, blin_cat,
                        wi_p, wh_p, bi_p, bh_p, n_steps)
    return out_p[:N, :D]


# ----------------------------------------------------------------------------
# Pure-JAX reference.  mxu_dtype=jnp.bfloat16 emulates the kernel's bf16 MXU
# operands (f32 accumulation); mxu_dtype=jnp.float32 is the original module.
# ----------------------------------------------------------------------------
def ggnn_reference(embed, w_enc_t, b_enc, A, Wlin_t, blin, gru, n_steps,
                   mxu_dtype=jnp.float32):
    (wir, wiz, win, whr, whz, whn, bir, biz, bin_, bhr, bhz, bhn) = gru
    c = lambda x: x.astype(mxu_dtype)
    dot = lambda a, b: jnp.dot(c(a), c(b), preferred_element_type=jnp.float32)
    h = jax.nn.relu(dot(embed, w_enc_t) + b_enc.reshape(1, -1))
    n_etypes = A.shape[0]
    for _ in range(n_steps):
        a = jnp.zeros_like(h)
        for t in range(n_etypes):
            a = a + dot(A[t], dot(h, Wlin_t[t]) + blin[t])
        r = jax.nn.sigmoid(dot(a, wir) + bir + dot(h, whr) + bhr)
        z = jax.nn.sigmoid(dot(a, wiz) + biz + dot(h, whz) + bhz)
        n = jnp.tanh(dot(a, win) + bin_ + r * (dot(h, whn) + bhn))
        h = (1.0 - z) * n + z * h
    return h


if __name__ == "__main__":
    # Small synthetic graph + deterministic parameters.
    N = 16            # number of nodes
    E = 48            # number of edges
    in_dim = 32       # input (embedding) dim
    num_classes = 32  # out_feats / GRU hidden size
    n_etypes = 3
    n_steps = 2

    key = jax.random.PRNGKey(0)
    keys = jax.random.split(key, 16)

    # graph structure; A[t, dst, src] = multiplicity of edge src->dst of type t
    src = jax.random.randint(keys[0], (E,), 0, N)
    dst = jax.random.randint(keys[1], (E,), 0, N)
    etypes = jax.random.randint(keys[2], (E,), 0, n_etypes)
    A = jnp.zeros((n_etypes, N, N), jnp.float32).at[etypes, dst, src].add(1.0)

    # node embeddings (the nn.Parameter `embed`)
    embed = jax.random.normal(keys[3], (N, in_dim), jnp.float32)

    # encoding linear (stored transposed: (in, out))
    w_enc_t = jax.random.normal(keys[4], (in_dim, num_classes), jnp.float32) * 0.1
    b_enc = jax.random.normal(keys[5], (num_classes,), jnp.float32) * 0.1

    # per-edge-type linears: xavier_normal(gain=relu), zero bias
    gain = float(np.sqrt(2.0))
    std = gain * np.sqrt(2.0 / (num_classes + num_classes))
    Wlin_t = jax.random.normal(
        keys[6], (n_etypes, num_classes, num_classes), jnp.float32) * std
    blin = jnp.zeros((n_etypes, 1, num_classes), jnp.float32)

    # GRUCell parameters (PyTorch gate order r, z, n)
    bound = 1.0 / np.sqrt(num_classes)
    def u(k, shape):
        return jax.random.uniform(k, shape, jnp.float32, -bound, bound)
    gkeys = jax.random.split(keys[7], 12)
    wir, wiz, win = (u(gkeys[i], (num_classes, num_classes)) for i in range(3))
    whr, whz, whn = (u(gkeys[3 + i], (num_classes, num_classes)) for i in range(3))
    bir, biz, bin_ = (u(gkeys[6 + i], (1, num_classes)) for i in range(3))
    bhr, bhz, bhn = (u(gkeys[9 + i], (1, num_classes)) for i in range(3))
    gru = (wir, wiz, win, whr, whz, whn, bir, biz, bin_, bhr, bhz, bhn)

    out = ggnn_forward(embed, w_enc_t, b_enc, A, Wlin_t, blin, gru, n_steps)
    out = jax.block_until_ready(out)

    # check against a reference with identical bf16-MXU-operand numerics
    ref = ggnn_reference(embed, w_enc_t, b_enc, A, Wlin_t, blin, gru, n_steps,
                         mxu_dtype=jnp.bfloat16)
    np.testing.assert_allclose(np.asarray(out), np.asarray(ref),
                               rtol=2e-3, atol=2e-3)

    print("KERNEL_OK")
</pallas_src>

<mosaic_0001>
module attributes {stable_mosaic.version = 11 : i64} {
  func.func @_ggnn_kernel(%arg0: i32, %arg1: i32, %arg2: i32, %arg3: memref<128x128xbf16, #tpu.memory_space<vmem>>, %arg4: memref<128x128xbf16, #tpu.memory_space<vmem>>, %arg5: memref<1x128xf32, #tpu.memory_space<vmem>>, %arg6: memref<3x128x128xbf16, #tpu.memory_space<vmem>>, %arg7: memref<128x384xbf16, #tpu.memory_space<vmem>>, %arg8: memref<1x384xf32, #tpu.memory_space<vmem>>, %arg9: memref<128x384xbf16, #tpu.memory_space<vmem>>, %arg10: memref<128x384xbf16, #tpu.memory_space<vmem>>, %arg11: memref<1x384xf32, #tpu.memory_space<vmem>>, %arg12: memref<1x384xf32, #tpu.memory_space<vmem>>, %arg13: memref<128x128xf32, #tpu.memory_space<vmem>>, %arg14: memref<128x128xf32, #tpu.memory_space<vmem>>, %arg15: memref<128x128xbf16, #tpu.memory_space<vmem>>, %arg16: memref<3x128x128xbf16, #tpu.memory_space<vmem>>, %arg17: memref<128x384xf32, #tpu.memory_space<vmem>>) attributes {dimension_semantics = [#tpu.dimension_semantics<arbitrary>, #tpu.dimension_semantics<arbitrary>, #tpu.dimension_semantics<arbitrary>], iteration_bounds = array<i64: 2, 3, 1>, scalar_prefetch = 0 : i64, scratch_operands = 4 : i64, tpu.core_type = #tpu.core_type<tc>, window_params = [{pipeline_mode = #tpu.pipeline_mode<synchronous>, transform_indices = @transform_0, window_bounds = array<i64: 128, 128>}, {pipeline_mode = #tpu.pipeline_mode<synchronous>, transform_indices = @transform_1, window_bounds = array<i64: 128, 128>}, {pipeline_mode = #tpu.pipeline_mode<synchronous>, transform_indices = @transform_2, window_bounds = array<i64: 1, 128>}, {pipeline_mode = #tpu.pipeline_mode<synchronous>, transform_indices = @transform_3, window_bounds = array<i64: 3, 128, 128>}, {pipeline_mode = #tpu.pipeline_mode<synchronous>, transform_indices = @transform_4, window_bounds = array<i64: 128, 384>}, {pipeline_mode = #tpu.pipeline_mode<synchronous>, transform_indices = @transform_5, window_bounds = array<i64: 1, 384>}, {pipeline_mode = #tpu.pipeline_mode<synchronous>, transform_indices = @transform_6, window_bounds = array<i64: 128, 384>}, {pipeline_mode = #tpu.pipeline_mode<synchronous>, transform_indices = @transform_7, window_bounds = array<i64: 128, 384>}, {pipeline_mode = #tpu.pipeline_mode<synchronous>, transform_indices = @transform_8, window_bounds = array<i64: 1, 384>}, {pipeline_mode = #tpu.pipeline_mode<synchronous>, transform_indices = @transform_9, window_bounds = array<i64: 1, 384>}, {pipeline_mode = #tpu.pipeline_mode<synchronous>, transform_indices = @transform_10, window_bounds = array<i64: 128, 128>}]} {
    %c0_i32 = arith.constant 0 : i32
    %0 = arith.cmpi eq, %arg0, %c0_i32 : i32
    %c0_i32_0 = arith.constant 0 : i32
    %1 = arith.cmpi eq, %arg1, %c0_i32_0 : i32
    %2 = arith.andi %0, %1 : i1
    %c0_i32_1 = arith.constant 0 : i32
    %3 = arith.cmpi eq, %arg2, %c0_i32_1 : i32
    %4 = arith.andi %2, %3 : i1
    %5 = arith.extui %4 : i1 to i32
    %c0_i32_2 = arith.constant 0 : i32
    %6 = arith.cmpi ne, %5, %c0_i32_2 : i32
    scf.if %6 {
      %c0_15 = arith.constant 0 : index
      %c0_16 = arith.constant 0 : index
      %27 = vector.load %arg3[%c0_15, %c0_16] : memref<128x128xbf16, #tpu.memory_space<vmem>>, vector<128x128xbf16>
      %c0_17 = arith.constant 0 : index
      %c0_18 = arith.constant 0 : index
      %28 = vector.load %arg4[%c0_17, %c0_18] : memref<128x128xbf16, #tpu.memory_space<vmem>>, vector<128x128xbf16>
      %cst_19 = arith.constant dense<0.000000e+00> : vector<128x128xf32>
      %29 = tpu.matmul %27, %28, %cst_19 {dimension_numbers = #tpu.dot_dimension_numbers<[1], [0], [0], [1], [0, 0, 1, 1], [], []>} : vector<128x128xbf16>, vector<128x128xbf16>, vector<128x128xf32> -> vector<128x128xf32>
      %c0_20 = arith.constant 0 : index
      %c0_21 = arith.constant 0 : index
      %30 = vector.load %arg5[%c0_20, %c0_21] : memref<1x128xf32, #tpu.memory_space<vmem>>, vector<1x128xf32>
      %31 = vector.broadcast %30 : vector<1x128xf32> to vector<128x128xf32>
      %32 = arith.addf %29, %31 : vector<128x128xf32>
      %cst_22 = arith.constant 0.000000e+00 : f32
      %33 = vector.broadcast %cst_22 : f32 to vector<128x128xf32>
      %34 = arith.maximumf %32, %33 : vector<128x128xf32>
      %c0_23 = arith.constant 0 : index
      %c0_24 = arith.constant 0 : index
      %35 = vector.load %arg13[%c0_23, %c0_24] : memref<128x128xf32, #tpu.memory_space<vmem>>, vector<128x128xf32>
      tpu.vector_store %arg13[%c0_23, %c0_24], %34 {strides = array<i32>} : memref<128x128xf32, #tpu.memory_space<vmem>>, vector<128x128xf32>,
      %36 = arith.truncf %34 : vector<128x128xf32> to vector<128x128xbf16>
      %c0_25 = arith.constant 0 : index
      %c0_26 = arith.constant 0 : index
      %37 = vector.load %arg15[%c0_25, %c0_26] : memref<128x128xbf16, #tpu.memory_space<vmem>>, vector<128x128xbf16>
      tpu.vector_store %arg15[%c0_25, %c0_26], %36 {strides = array<i32>} : memref<128x128xbf16, #tpu.memory_space<vmem>>, vector<128x128xbf16>,
    } else {
    }
    %c0_i32_3 = arith.constant 0 : i32
    %7 = arith.cmpi eq, %arg1, %c0_i32_3 : i32
    %c0_i32_4 = arith.constant 0 : i32
    %8 = arith.cmpi eq, %arg2, %c0_i32_4 : i32
    %9 = arith.andi %7, %8 : i1
    %10 = arith.extui %9 : i1 to i32
    %c0_i32_5 = arith.constant 0 : i32
    %11 = arith.cmpi ne, %10, %c0_i32_5 : i32
    scf.if %11 {
      %cst_15 = arith.constant 0.000000e+00 : f32
      %27 = vector.broadcast %cst_15 : f32 to vector<128x128xf32>
      %c0_16 = arith.constant 0 : index
      %c0_17 = arith.constant 0 : index
      %28 = vector.load %arg14[%c0_16, %c0_17] : memref<128x128xf32, #tpu.memory_space<vmem>>, vector<128x128xf32>
      tpu.vector_store %arg14[%c0_16, %c0_17], %27 {strides = array<i32>} : memref<128x128xf32, #tpu.memory_space<vmem>>, vector<128x128xf32>,
      %c0_18 = arith.constant 0 : index
      %c0_19 = arith.constant 0 : index
      %29 = vector.load %arg15[%c0_18, %c0_19] : memref<128x128xbf16, #tpu.memory_space<vmem>>, vector<128x128xbf16>
      %c0_20 = arith.constant 0 : index
      %c0_21 = arith.constant 0 : index
      %30 = vector.load %arg7[%c0_20, %c0_21] : memref<128x384xbf16, #tpu.memory_space<vmem>>, vector<128x384xbf16>
      %cst_22 = arith.constant dense<0.000000e+00> : vector<128x384xf32>
      %31 = tpu.matmul %29, %30, %cst_22 {dimension_numbers = #tpu.dot_dimension_numbers<[1], [0], [0], [1], [0, 0, 1, 1], [], []>} : vector<128x128xbf16>, vector<128x384xbf16>, vector<128x384xf32> -> vector<128x384xf32>
      %c0_23 = arith.constant 0 : index
      %c0_24 = arith.constant 0 : index
      %32 = vector.load %arg8[%c0_23, %c0_24] : memref<1x384xf32, #tpu.memory_space<vmem>>, vector<1x384xf32>
      %33 = vector.broadcast %32 : vector<1x384xf32> to vector<128x384xf32>
      %34 = arith.addf %31, %33 : vector<128x384xf32>
      %35 = vector.extract_strided_slice %34 {offsets = [0, 0], sizes = [128, 128], strides = [1, 1]} : vector<128x384xf32> to vector<128x128xf32>
      %36 = arith.truncf %35 : vector<128x128xf32> to vector<128x128xbf16>
      %c0_25 = arith.constant 0 : index
      %c0_26 = arith.constant 0 : index
      %c0_27 = arith.constant 0 : index
      %37 = vector.load %arg16[%c0_25, %c0_26, %c0_27] : memref<3x128x128xbf16, #tpu.memory_space<vmem>>, vector<1x128x128xbf16>
      %38 = vector.shape_cast %37 : vector<1x128x128xbf16> to vector<128x128xbf16>
      %39 = vector.shape_cast %36 : vector<128x128xbf16> to vector<1x128x128xbf16>
      tpu.vector_store %arg16[%c0_25, %c0_26, %c0_27], %39 {strides = array<i32>} : memref<3x128x128xbf16, #tpu.memory_space<vmem>>, vector<1x128x128xbf16>,
      %40 = vector.extract_strided_slice %34 {offsets = [0, 128], sizes = [128, 128], strides = [1, 1]} : vector<128x384xf32> to vector<128x128xf32>
      %41 = arith.truncf %40 : vector<128x128xf32> to vector<128x128xbf16>
      %c1 = arith.constant 1 : index
      %c0_28 = arith.constant 0 : index
      %c0_29 = arith.constant 0 : index
      %42 = vector.load %arg16[%c1, %c0_28, %c0_29] : memref<3x128x128xbf16, #tpu.memory_space<vmem>>, vector<1x128x128xbf16>
      %43 = vector.shape_cast %42 : vector<1x128x128xbf16> to vector<128x128xbf16>
      %44 = vector.shape_cast %41 : vector<128x128xbf16> to vector<1x128x128xbf16>
      tpu.vector_store %arg16[%c1, %c0_28, %c0_29], %44 {strides = array<i32>} : memref<3x128x128xbf16, #tpu.memory_space<vmem>>, vector<1x128x128xbf16>,
      %45 = vector.extract_strided_slice %34 {offsets = [0, 256], sizes = [128, 128], strides = [1, 1]} : vector<128x384xf32> to vector<128x128xf32>
      %46 = arith.truncf %45 : vector<128x128xf32> to vector<128x128xbf16>
      %c2 = arith.constant 2 : index
      %c0_30 = arith.constant 0 : index
      %c0_31 = arith.constant 0 : index
      %47 = vector.load %arg16[%c2, %c0_30, %c0_31] : memref<3x128x128xbf16, #tpu.memory_space<vmem>>, vector<1x128x128xbf16>
      %48 = vector.shape_cast %47 : vector<1x128x128xbf16> to vector<128x128xbf16>
      %49 = vector.shape_cast %46 : vector<128x128xbf16> to vector<1x128x128xbf16>
      tpu.vector_store %arg16[%c2, %c0_30, %c0_31], %49 {strides = array<i32>} : memref<3x128x128xbf16, #tpu.memory_space<vmem>>, vector<1x128x128xbf16>,
      %c0_32 = arith.constant 0 : index
      %c0_33 = arith.constant 0 : index
      %50 = vector.load %arg10[%c0_32, %c0_33] : memref<128x384xbf16, #tpu.memory_space<vmem>>, vector<128x384xbf16>
      %cst_34 = arith.constant dense<0.000000e+00> : vector<128x384xf32>
      %51 = tpu.matmul %29, %50, %cst_34 {dimension_numbers = #tpu.dot_dimension_numbers<[1], [0], [0], [1], [0, 0, 1, 1], [], []>} : vector<128x128xbf16>, vector<128x384xbf16>, vector<128x384xf32> -> vector<128x384xf32>
      %c0_35 = arith.constant 0 : index
      %c0_36 = arith.constant 0 : index
      %52 = vector.load %arg12[%c0_35, %c0_36] : memref<1x384xf32, #tpu.memory_space<vmem>>, vector<1x384xf32>
      %53 = vector.broadcast %52 : vector<1x384xf32> to vector<128x384xf32>
      %54 = arith.addf %51, %53 : vector<128x384xf32>
      %c0_37 = arith.constant 0 : index
      %c0_38 = arith.constant 0 : index
      %55 = vector.load %arg17[%c0_37, %c0_38] : memref<128x384xf32, #tpu.memory_space<vmem>>, vector<128x384xf32>
      tpu.vector_store %arg17[%c0_37, %c0_38], %54 {strides = array<i32>} : memref<128x384xf32, #tpu.memory_space<vmem>>, vector<128x384xf32>,
    } else {
    }
    %c0 = arith.constant 0 : index
    %c0_6 = arith.constant 0 : index
    %12 = vector.load %arg14[%c0, %c0_6] : memref<128x128xf32, #tpu.memory_space<vmem>>, vector<128x128xf32>
    %13 = arith.index_cast %arg1 : i32 to index
    %c0_7 = arith.constant 0 : index
    %c0_8 = arith.constant 0 : index
    %14 = vector.load %arg6[%13, %c0_7, %c0_8] : memref<3x128x128xbf16, #tpu.memory_space<vmem>>, vector<1x128x128xbf16>
    %15 = vector.shape_cast %14 : vector<1x128x128xbf16> to vector<128x128xbf16>
    %16 = arith.index_cast %arg1 : i32 to index
    %c0_9 = arith.constant 0 : index
    %c0_10 = arith.constant 0 : index
    %17 = vector.load %arg16[%16, %c0_9, %c0_10] : memref<3x128x128xbf16, #tpu.memory_space<vmem>>, vector<1x128x128xbf16>
    %18 = vector.shape_cast %17 : vector<1x128x128xbf16> to vector<128x128xbf16>
    %cst = arith.constant dense<0.000000e+00> : vector<128x128xf32>
    %19 = tpu.matmul %15, %18, %cst {dimension_numbers = #tpu.dot_dimension_numbers<[1], [0], [0], [1], [0, 0, 1, 1], [], []>} : vector<128x128xbf16>, vector<128x128xbf16>, vector<128x128xf32> -> vector<128x128xf32>
    %20 = arith.addf %12, %19 : vector<128x128xf32>
    %c0_11 = arith.constant 0 : index
    %c0_12 = arith.constant 0 : index
    %21 = vector.load %arg14[%c0_11, %c0_12] : memref<128x128xf32, #tpu.memory_space<vmem>>, vector<128x128xf32>
    tpu.vector_store %arg14[%c0_11, %c0_12], %20 {strides = array<i32>} : memref<128x128xf32, #tpu.memory_space<vmem>>, vector<128x128xf32>,
    %c2_i32 = arith.constant 2 : i32
    %22 = arith.cmpi eq, %arg1, %c2_i32 : i32
    %c0_i32_13 = arith.constant 0 : i32
    %23 = arith.cmpi eq, %arg2, %c0_i32_13 : i32
    %24 = arith.andi %22, %23 : i1
    %25 = arith.extui %24 : i1 to i32
    %c0_i32_14 = arith.constant 0 : i32
    %26 = arith.cmpi ne, %25, %c0_i32_14 : i32
    scf.if %26 {
      %c0_15 = arith.constant 0 : index
      %c0_16 = arith.constant 0 : index
      %27 = vector.load %arg13[%c0_15, %c0_16] : memref<128x128xf32, #tpu.memory_space<vmem>>, vector<128x128xf32>
      %c0_17 = arith.constant 0 : index
      %c0_18 = arith.constant 0 : index
      %28 = vector.load %arg14[%c0_17, %c0_18] : memref<128x128xf32, #tpu.memory_space<vmem>>, vector<128x128xf32>
      %29 = arith.truncf %28 : vector<128x128xf32> to vector<128x128xbf16>
      %c0_19 = arith.constant 0 : index
      %c0_20 = arith.constant 0 : index
      %30 = vector.load %arg9[%c0_19, %c0_20] : memref<128x384xbf16, #tpu.memory_space<vmem>>, vector<128x384xbf16>
      %cst_21 = arith.constant dense<0.000000e+00> : vector<128x384xf32>
      %31 = tpu.matmul %29, %30, %cst_21 {dimension_numbers = #tpu.dot_dimension_numbers<[1], [0], [0], [1], [0, 0, 1, 1], [], []>} : vector<128x128xbf16>, vector<128x384xbf16>, vector<128x384xf32> -> vector<128x384xf32>
      %c0_22 = arith.constant 0 : index
      %c0_23 = arith.constant 0 : index
      %32 = vector.load %arg11[%c0_22, %c0_23] : memref<1x384xf32, #tpu.memory_space<vmem>>, vector<1x384xf32>
      %33 = vector.broadcast %32 : vector<1x384xf32> to vector<128x384xf32>
      %34 = arith.addf %31, %33 : vector<128x384xf32>
      %c0_24 = arith.constant 0 : index
      %c0_25 = arith.constant 0 : index
      %35 = vector.load %arg17[%c0_24, %c0_25] : memref<128x384xf32, #tpu.memory_space<vmem>>, vector<128x384xf32>
      %36 = vector.extract_strided_slice %34 {offsets = [0, 0], sizes = [128, 128], strides = [1, 1]} : vector<128x384xf32> to vector<128x128xf32>
      %37 = vector.extract_strided_slice %35 {offsets = [0, 0], sizes = [128, 128], strides = [1, 1]} : vector<128x384xf32> to vector<128x128xf32>
      %38 = arith.addf %36, %37 : vector<128x128xf32>
      %39 = arith.negf %38 : vector<128x128xf32>
      %40 = math.exp %39 : vector<128x128xf32>
      %cst_26 = arith.constant 1.000000e+00 : f32
      %41 = vector.broadcast %cst_26 : f32 to vector<128x128xf32>
      %42 = arith.addf %41, %40 : vector<128x128xf32>
      %43 = arith.divf %41, %42 : vector<128x128xf32>
      %44 = vector.extract_strided_slice %34 {offsets = [0, 128], sizes = [128, 128], strides = [1, 1]} : vector<128x384xf32> to vector<128x128xf32>
      %45 = vector.extract_strided_slice %35 {offsets = [0, 128], sizes = [128, 128], strides = [1, 1]} : vector<128x384xf32> to vector<128x128xf32>
      %46 = arith.addf %44, %45 : vector<128x128xf32>
      %47 = arith.negf %46 : vector<128x128xf32>
      %48 = math.exp %47 : vector<128x128xf32>
      %cst_27 = arith.constant 1.000000e+00 : f32
      %49 = vector.broadcast %cst_27 : f32 to vector<128x128xf32>
      %50 = arith.addf %49, %48 : vector<128x128xf32>
      %51 = arith.divf %49, %50 : vector<128x128xf32>
      %52 = vector.extract_strided_slice %34 {offsets = [0, 256], sizes = [128, 128], strides = [1, 1]} : vector<128x384xf32> to vector<128x128xf32>
      %53 = vector.extract_strided_slice %35 {offsets = [0, 256], sizes = [128, 128], strides = [1, 1]} : vector<128x384xf32> to vector<128x128xf32>
      %54 = arith.mulf %43, %53 : vector<128x128xf32>
      %55 = arith.addf %52, %54 : vector<128x128xf32>
      %56 = math.tanh %55 : vector<128x128xf32>
      %cst_28 = arith.constant 1.000000e+00 : f32
      %57 = vector.broadcast %cst_28 : f32 to vector<128x128xf32>
      %58 = arith.subf %57, %51 : vector<128x128xf32>
      %59 = arith.mulf %58, %56 : vector<128x128xf32>
      %60 = arith.mulf %51, %27 : vector<128x128xf32>
      %61 = arith.addf %59, %60 : vector<128x128xf32>
      %c0_29 = arith.constant 0 : index
      %c0_30 = arith.constant 0 : index
      %62 = vector.load %arg13[%c0_29, %c0_30] : memref<128x128xf32, #tpu.memory_space<vmem>>, vector<128x128xf32>
      tpu.vector_store %arg13[%c0_29, %c0_30], %61 {strides = array<i32>} : memref<128x128xf32, #tpu.memory_space<vmem>>, vector<128x128xf32>,
      %63 = arith.truncf %61 : vector<128x128xf32> to vector<128x128xbf16>
      %c0_31 = arith.constant 0 : index
      %c0_32 = arith.constant 0 : index
      %64 = vector.load %arg15[%c0_31, %c0_32] : memref<128x128xbf16, #tpu.memory_space<vmem>>, vector<128x128xbf16>
      tpu.vector_store %arg15[%c0_31, %c0_32], %63 {strides = array<i32>} : memref<128x128xbf16, #tpu.memory_space<vmem>>, vector<128x128xbf16>,
    } else {
    }
    return
  }
  func.func @transform_0(%arg0: i32, %arg1: i32, %arg2: i32) -> (i32, i32) {
    %c0_i32 = arith.constant 0 : i32
    %c0_i32_0 = arith.constant 0 : i32
    %c0_i32_1 = arith.constant 0 : i32
    return %c0_i32, %c0_i32_0 : i32, i32
  }
  func.func @transform_1(%arg0: i32, %arg1: i32, %arg2: i32) -> (i32, i32) {
    %c0_i32 = arith.constant 0 : i32
    %c0_i32_0 = arith.constant 0 : i32
    %c0_i32_1 = arith.constant 0 : i32
    return %c0_i32, %c0_i32_0 : i32, i32
  }
  func.func @transform_2(%arg0: i32, %arg1: i32, %arg2: i32) -> (i32, i32) {
    %c0_i32 = arith.constant 0 : i32
    %c0_i32_0 = arith.constant 0 : i32
    %c0_i32_1 = arith.constant 0 : i32
    return %c0_i32, %c0_i32_0 : i32, i32
  }
  func.func @transform_3(%arg0: i32, %arg1: i32, %arg2: i32) -> (i32, i32, i32) {
    %c0_i32 = arith.constant 0 : i32
    %c0_i32_0 = arith.constant 0 : i32
    %c0_i32_1 = arith.constant 0 : i32
    %c0_i32_2 = arith.constant 0 : i32
    return %c0_i32, %c0_i32_0, %c0_i32_1 : i32, i32, i32
  }
  func.func @transform_4(%arg0: i32, %arg1: i32, %arg2: i32) -> (i32, i32) {
    %c0_i32 = arith.constant 0 : i32
    %c0_i32_0 = arith.constant 0 : i32
    %c0_i32_1 = arith.constant 0 : i32
    return %c0_i32, %c0_i32_0 : i32, i32
  }
  func.func @transform_5(%arg0: i32, %arg1: i32, %arg2: i32) -> (i32, i32) {
    %c0_i32 = arith.constant 0 : i32
    %c0_i32_0 = arith.constant 0 : i32
    %c0_i32_1 = arith.constant 0 : i32
    return %c0_i32, %c0_i32_0 : i32, i32
  }
  func.func @transform_6(%arg0: i32, %arg1: i32, %arg2: i32) -> (i32, i32) {
    %c0_i32 = arith.constant 0 : i32
    %c0_i32_0 = arith.constant 0 : i32
    %c0_i32_1 = arith.constant 0 : i32
    return %c0_i32, %c0_i32_0 : i32, i32
  }
  func.func @transform_7(%arg0: i32, %arg1: i32, %arg2: i32) -> (i32, i32) {
    %c0_i32 = arith.constant 0 : i32
    %c0_i32_0 = arith.constant 0 : i32
    %c0_i32_1 = arith.constant 0 : i32
    return %c0_i32, %c0_i32_0 : i32, i32
  }
  func.func @transform_8(%arg0: i32, %arg1: i32, %arg2: i32) -> (i32, i32) {
    %c0_i32 = arith.constant 0 : i32
    %c0_i32_0 = arith.constant 0 : i32
    %c0_i32_1 = arith.constant 0 : i32
    return %c0_i32, %c0_i32_0 : i32, i32
  }
  func.func @transform_9(%arg0: i32, %arg1: i32, %arg2: i32) -> (i32, i32) {
    %c0_i32 = arith.constant 0 : i32
    %c0_i32_0 = arith.constant 0 : i32
    %c0_i32_1 = arith.constant 0 : i32
    return %c0_i32, %c0_i32_0 : i32, i32
  }
  func.func @transform_10(%arg0: i32, %arg1: i32, %arg2: i32) -> (i32, i32) {
    %c0_i32 = arith.constant 0 : i32
    %c0_i32_0 = arith.constant 0 : i32
    %c0_i32_1 = arith.constant 0 : i32
    return %c0_i32, %c0_i32_0 : i32, i32
  }
}

</mosaic_0001>

<bundles_post_ra>
// kernel: tpu_custom_call.1
= control target key start
LH: loop header
LB: loop body
LE: loop exit
PB: predicated region body
PF: predicated region fallthrough
CT: control target
= control target key end

     0   :  { %s4627_s0 = inlined_call_operand.hbm [shape: bf16[128,128], index: 0, kind: input, shape index: {}]   ;;  %s4628_s1 = inlined_call_operand.hbm [shape: bf16[128,128], index: 1, kind: input, shape index: {}]   ;;  %s4629_s2 = inlined_call_operand.vmem [shape: f32[1,128], index: 2, kind: input, shape index: {}]   ;;  %s4630_s3 = inlined_call_operand.hbm [shape: bf16[3,128,128], index: 3, kind: input, shape index: {}]   ;;  %s4631_s4 = inlined_call_operand.hbm [shape: bf16[128,384], index: 4, kind: input, shape index: {}]   ;;  %s4632_s5 = inlined_call_operand.vmem [shape: f32[1,384], index: 5, kind: input, shape index: {}]   ;;  %s4633_s6 = inlined_call_operand.hbm [shape: bf16[128,384], index: 6, kind: input, shape index: {}]   ;;  %s4634_s7 = inlined_call_operand.hbm [shape: bf16[128,384], index: 7, kind: input, shape index: {}]   ;;  %s4635_s8 = inlined_call_operand.vmem [shape: f32[1,384], index: 8, kind: input, shape index: {}]   ;;  %s4636_s9 = inlined_call_operand.vmem [shape: f32[1,384], index: 9, kind: input, shape index: {}]   ;;  %s4637_s10 = inlined_call_operand.hbm [shape: f32[128,128], index: 10, kind: output, shape index: {}]  }
   0x1   :  { %4652 = sst [smem:[#allocation24_spill]] %s4627_s0 }
   0x2   :  { %4653 = sst [smem:[#allocation25_spill]] %s4628_s1 }
   0x3   :  { %4654 = sst [smem:[#allocation26_spill]] %s4635_s8 }
   0x4   :  { %4655 = sst [smem:[#allocation27_spill]] %s4636_s9 }
   0x5   :  { %4656 = sst [smem:[#allocation28_spill]] %s4637_s10 }
   0x6   :  { %15 = vsyncpa [#allocation7], 0 }
   0x7   :  { %16 = vsyncpa [#allocation10], 0 }
   0x8   :  { %17 = vsyncpa [#allocation13], 0 }
   0x9   :  { %18 = vsyncpa [#allocation16], 0 }
   0xa   :  { %19 = vsyncpa [#allocation8], 0  ;;  %s3962_s13 = smov 0   ;;  %s3964_s14 = smov 0  }
   0xb   :  { %s3966_s15 = smov 0   ;;  %s3968_s16 = smov 0  }
   0xc   :  { %s3970_s17 = smov 0  }
   0xd LB: > { %4657 = sst [smem:[#allocation23_spill]] %s3889_s17  ;;  %s4641_s18 = sadd.s32 4294967295, %s3889_s17   ;;  %s3889_s17 = sphi %s3970_s17, %s25_s17   ;;  %s3885_s16 = sphi %s3968_s16, %s4682_s16   ;;  %s3881_s15 = sphi %s3966_s15, %s4681_s15   ;;  %s3877_s14 = sphi %s3964_s14, %s4680_s14   ;;  %s3873_s13 = sphi %s3962_s13, %s4679_s13  }
   0xe   : > { %p2810_p0 = scmp.ge.s32.totalorder %s3889_s17, 1  ;;  %p280_p1 = scmp.lt.s32.totalorder %s3889_s17, 7 }
   0xf   : > { %p3992_p2 = scmp.eq.s32.totalorder %s4641_s18, 0  ;;  %s3891_s21 = smov [#allocation9]  }
  0x10   : > { %p3996_p3 = pnand %p2810_p0, %p280_p1  ;;  %s305_s22 = sshll.u32 %s3891_s21, 4  ;;  %s306_s22 = int_to_ptr.vmem [resolvable:$true] %s305_s22 }
  0x11   : > { %s4658_s19 = scalar_select %p3992_p2, 1, 0 }
  0x12   : > { %s4659_s20 = scalar_select %p3996_p3, 1, 0 }
  0x13   : > { %p3268_p4 = pneg %p3996_p3  ;;  %s3892_s23 = smov [#allocation12]  }
  0x14   : > { %s334_s24 = sshll.u32 %s3892_s23, 4  ;;  %s4661_s1 = sld [smem:[#allocation25_spill]]  ;;  %s4002_s24 = int_to_ptr.vmem [resolvable:$true] %s334_s24 }
  0x15   : > { %p4006_p5 = pnand %p3992_p2, %p3268_p4 }
  0x17   : > { %p4018_p7 = pneg %p4006_p5 }
  0x1a   : > { %s3637_s28 = scalar_lea.hbm %s4661_s1, 1024 }
  0x1b   : > { %p3638_p6 = scmp.ne.s32.totalorder %s4661_s1, %s3637_s28  ;;  %p3644_p10 = scmp.lt.u32.totalorder %s3637_s28, %s4661_s1 }
  0x1d   : > { %p3640_p8 = pnand %p4018_p7, %p3638_p6 }
  0x1f   : > { %p3641_p9 = pneg %p3640_p8 }
  0x21   : > { %p3646_p11 = pnand %p3644_p10, %p3641_p9 }
  0x23   : > { %3649 = shalt.err (!%p3646_p11)
}
  0x24   : > { %s3650_s23 = scalar_lea.vmem %s306_s22, 1024  ;;  %p3658_p1 = scmp.lt.s32.totalorder %s306_s22, %s306_s22 }
  0x25   : > { %p3651_p12 = scmp.ne.s32.totalorder %s306_s22, %s3650_s23  ;;  %p3659_p4 = scmp.lt.s32.totalorder %s3650_s23, %s3650_s23 }
  0x27   : > { %p3653_p13 = pnand %p3651_p12, %p4018_p7  ;;  %p3660_p2 = por %p3659_p4, %p3658_p1 }
  0x29   : > { %p3654_p0 = pneg %p3653_p13 }
  0x2b   : > { %p3661_p3 = pnand %p3660_p2, %p3654_p0 }
  0x2d   : > { %3664 = shalt.err (!%p3661_p3)
}
  0x2e   : > { %s4644_s26 = smov 64   ;;  %s4646_s27 = smov 4  }
  0x2f   : > { %3274 = dma.hbm_to_vmem [thread:$0]  (!%p4006_p5), %s4661_s1, 1024, %s306_s22, [#allocation10], %s4644_s26, %s4644_s26, %s4646_s27  }
  0x30   : > { %s3665_s21 = scalar_lea.hbm %s4631_s4, 3072 }
  0x31   : > { %p3666_p2 = scmp.ne.s32.totalorder %s4631_s4, %s3665_s21  ;;  %p3672_p8 = scmp.lt.u32.totalorder %s3665_s21, %s4631_s4 }
  0x33   : > { %p3668_p3 = pnand %p3666_p2, %p4018_p7 }
  0x35   : > { %p3669_p6 = pneg %p3668_p3 }
  0x37   : > { %p3674_p9 = pnand %p3672_p8, %p3669_p6 }
  0x39   : > { %3677 = shalt.err (!%p3674_p9)
}
  0x3a   : > { %s3678_s22 = scalar_lea.vmem %s4002_s24, 3072  ;;  %p3686_p13 = scmp.lt.s32.totalorder %s4002_s24, %s4002_s24 }
  0x3b   : > { %p3679_p10 = scmp.ne.s32.totalorder %s4002_s24, %s3678_s22  ;;  %p3687_p0 = scmp.lt.s32.totalorder %s3678_s22, %s3678_s22 }
  0x3d   : > { %p3681_p11 = pnand %p3679_p10, %p4018_p7  ;;  %p3688_p1 = por %p3687_p0, %p3686_p13 }
  0x3f   : > { %p3682_p12 = pneg %p3681_p11 }
  0x41   : > { %p3689_p4 = pnand %p3688_p1, %p3682_p12 }
  0x43   : > { %3692 = shalt.err (!%p3689_p4)
}
  0x44   : > { %s4648_s18 = smov 192   ;;  %s4650_s10 = smov 12  }
  0x45   : > { %3280 = dma.hbm_to_vmem [thread:$0]  (!%p4006_p5), %s4631_s4, 3072, %s4002_s24, [#allocation13], %s4648_s18, %s4648_s18, %s4650_s10  }
  0x46   : > { %s40_s29 = sadd.s32 1, %s3881_s15  ;;  %s44_s30 = sadd.s32 1, %s3885_s16 }
  0x47   : > { %p42_p2 = scmp.ge.s32.totalorder %s40_s29, 3  ;;  %s3897_s12 = smov [#allocation6]  }
  0x48   : > { %s292_s21 = sshll.u32 %s3897_s12, 4  ;;  %s3898_s23 = smov [#allocation11]   ;;  %s293_s21 = int_to_ptr.vmem [resolvable:$true] %s292_s21 }
  0x49   : > { %s4684_s29 = smov (%p42_p2, %s40_s29), 0  ;;  %s4686_s30 = smov (!%p42_p2, %s44_s30), %s3885_s16 }
  0x4a   : > { %s321_s22 = sshll.u32 %s3898_s23, 4  ;;  %s4663_s0 = sld [smem:[#allocation24_spill]]  ;;  %s322_s22 = int_to_ptr.vmem [resolvable:$true] %s321_s22 }
  0x50   : > { %s3693_s1 = scalar_lea.hbm %s4663_s0, 1024 }
  0x51   : > { %p3694_p6 = scmp.ne.s32.totalorder %s4663_s0, %s3693_s1  ;;  %p3700_p10 = scmp.lt.u32.totalorder %s3693_s1, %s4663_s0 }
  0x53   : > { %p3696_p8 = pnand %p3694_p6, %p4018_p7 }
  0x55   : > { %p3697_p9 = pneg %p3696_p8 }
  0x57   : > { %p3702_p11 = pnand %p3700_p10, %p3697_p9 }
  0x59   : > { %3705 = shalt.err (!%p3702_p11)
}
  0x5a   : > { %s3706_s28 = scalar_lea.vmem %s293_s21, 1024  ;;  %p3714_p1 = scmp.lt.s32.totalorder %s293_s21, %s293_s21 }
  0x5b   : > { %p3707_p12 = scmp.ne.s32.totalorder %s293_s21, %s3706_s28  ;;  %p3715_p4 = scmp.lt.s32.totalorder %s3706_s28, %s3706_s28 }
  0x5d   : > { %p3709_p13 = pnand %p3707_p12, %p4018_p7  ;;  %p3716_p2 = por %p3715_p4, %p3714_p1 }
  0x5f   : > { %p3710_p0 = pneg %p3709_p13 }
  0x61   : > { %p3717_p3 = pnand %p3716_p2, %p3710_p0 }
  0x63   : > { %3720 = shalt.err (!%p3717_p3)
}
  0x64   : > { %s4664_s8 = smov 4   ;;  %s4665_s9 = smov 64  }
  0x65   : > { %3271 = dma.hbm_to_vmem [thread:$0]  (!%p4006_p5), %s4663_s0, 1024, %s293_s21, [#allocation7], %s4665_s9, %s4665_s9, %s4664_s8  }
  0x66   : > { %p4666_p6 = scmp.ge.s32.totalorder %s4686_s30, 2  ;;  %s3721_s23 = scalar_lea.hbm %s4630_s3, 3072 }
  0x67   : > { %p3722_p3 = scmp.ne.s32.totalorder %s4630_s3, %s3721_s23  ;;  %p3728_p10 = scmp.lt.u32.totalorder %s3721_s23, %s4630_s3 }
  0x68   : > { %s4688_s30 = smov (%p4666_p6, %s4686_s30), 0 }
  0x69   : > { %p3724_p8 = pnand %p3722_p3, %p4018_p7 }
  0x6b   : > { %p3725_p9 = pneg %p3724_p8 }
  0x6d   : > { %p3730_p11 = pnand %p3728_p10, %p3725_p9 }
  0x6f   : > { %3733 = shalt.err (!%p3730_p11)
}
  0x70   : > { %s3734_s21 = scalar_lea.vmem %s322_s22, 3072  ;;  %p3742_p1 = scmp.lt.s32.totalorder %s322_s22, %s322_s22 }
  0x71   : > { %p3735_p12 = scmp.ne.s32.totalorder %s322_s22, %s3734_s21  ;;  %p3743_p4 = scmp.lt.s32.totalorder %s3734_s21, %s3734_s21 }
  0x73   : > { %p3737_p13 = pnand %p3735_p12, %p4018_p7  ;;  %p3744_p2 = por %p3743_p4, %p3742_p1 }
  0x75   : > { %p3738_p0 = pneg %p3737_p13 }
  0x77   : > { %p3745_p6 = pnand %p3744_p2, %p3738_p0 }
  0x79   : > { %3748 = shalt.err (!%p3745_p6)
}
  0x7a   : > { %3277 = dma.hbm_to_vmem [thread:$0]  (!%p4006_p5), %s4630_s3, 3072, %s322_s22, [#allocation10], %s4665_s9, %s4665_s9, %s4664_s8  }
  0x7b   : > { %s3899_s1 = smov [#allocation14]   ;;  %s3900_s12 = smov [#allocation15]  }
  0x7c   : > { %s350_s27 = sshll.u32 %s3899_s1, 4  ;;  %s363_s23 = sshll.u32 %s3900_s12, 4  ;;  %s351_s27 = int_to_ptr.vmem [resolvable:$true] %s350_s27  ;;  %s364_s23 = int_to_ptr.vmem [resolvable:$true] %s363_s23 }
  0x7d   : > { %s3749_s28 = scalar_lea.hbm %s4633_s6, 3072 }
  0x7e   : > { %p3750_p3 = scmp.ne.s32.totalorder %s4633_s6, %s3749_s28  ;;  %p3756_p10 = scmp.lt.u32.totalorder %s3749_s28, %s4633_s6 }
  0x80   : > { %p3752_p8 = pnand %p3750_p3, %p4018_p7 }
  0x82   : > { %p3753_p9 = pneg %p3752_p8 }
  0x84   : > { %p3758_p11 = pnand %p3756_p10, %p3753_p9 }
  0x86   : > { %3761 = shalt.err (!%p3758_p11)
}
  0x87   : > { %s3762_s22 = scalar_lea.vmem %s351_s27, 3072  ;;  %p3770_p1 = scmp.lt.s32.totalorder %s351_s27, %s351_s27 }
  0x88   : > { %p3763_p12 = scmp.ne.s32.totalorder %s351_s27, %s3762_s22  ;;  %p3771_p4 = scmp.lt.s32.totalorder %s3762_s22, %s3762_s22 }
  0x8a   : > { %p3765_p13 = pnand %p3763_p12, %p4018_p7  ;;  %p3772_p2 = por %p3771_p4, %p3770_p1 }
  0x8c   : > { %p3766_p0 = pneg %p3765_p13 }
  0x8e   : > { %p3773_p6 = pnand %p3772_p2, %p3766_p0 }
  0x90   : > { %3776 = shalt.err (!%p3773_p6)
}
  0x91   : > { %s4667_s10 = smov 12   ;;  %s4668_s8 = smov 192  }
  0x92   : > { %3283 = dma.hbm_to_vmem [thread:$0]  (!%p4006_p5), %s4633_s6, 3072, %s351_s27, [#allocation13], %s4668_s8, %s4668_s8, %s4667_s10  }
  0x93   : > { %s3777_s12 = scalar_lea.hbm %s4634_s7, 3072 }
  0x94   : > { %p3778_p3 = scmp.ne.s32.totalorder %s4634_s7, %s3777_s12  ;;  %p3784_p10 = scmp.lt.u32.totalorder %s3777_s12, %s4634_s7 }
  0x96   : > { %p3780_p8 = pnand %p3778_p3, %p4018_p7 }
  0x98   : > { %p3781_p9 = pneg %p3780_p8 }
  0x9a   : > { %p3786_p11 = pnand %p3784_p10, %p3781_p9 }
  0x9c   : > { %3789 = shalt.err (!%p3786_p11)
}
  0x9d   : > { %s3790_s18 = scalar_lea.vmem %s364_s23, 3072  ;;  %p3798_p1 = scmp.lt.s32.totalorder %s364_s23, %s364_s23 }
  0x9e   : > { %p3791_p12 = scmp.ne.s32.totalorder %s364_s23, %s3790_s18  ;;  %p3799_p4 = scmp.lt.s32.totalorder %s3790_s18, %s3790_s18 }
  0xa0   : > { %p3793_p13 = pnand %p3791_p12, %p4018_p7  ;;  %p3800_p2 = por %p3799_p4, %p3798_p1 }
  0xa2   : > { %p3794_p0 = pneg %p3793_p13 }
  0xa4   : > { %p3801_p6 = pnand %p3800_p2, %p3794_p0 }
  0xa6   : > { %3804 = shalt.err (!%p3801_p6)
}
  0xa7   : > { %3286 = dma.hbm_to_vmem [thread:$0]  (!%p4006_p5), %s4634_s7, 3072, %s364_s23, [#allocation16], %s4668_s8, %s4668_s8, %s4667_s10  }
  0xa8   : > { %p4669_p3 = scmp.ne.s32.totalorder %s4659_s20, 0 }
  0xa9   : > { %p4670_p7 = scmp.ne.s32.totalorder (!%p4669_p3), %s4658_s19, 0 }
  0xaa   : > { %385 = sbr.rel (%p4669_p3) target bundleno = 1420 (0x58c), region = 60 }
  0xb1   : > { %3852 = dma.done.wait (%p4670_p7), [#allocation7], 1024  }
  0xb2   : > { %3854 = vsyncadd (%p4670_p7), [#allocation7], 4294966272 }
  0xb3   : > { %3856 = dma.done.wait (%p4670_p7), [#allocation10], 4096  }
  0xb4   : > { %3858 = vsyncadd (%p4670_p7), [#allocation10], 4294963200 }
  0xb5   : > { %3860 = dma.done.wait (%p4670_p7), [#allocation13], 6144  }
  0xb6   : > { %3862 = vsyncadd (%p4670_p7), [#allocation13], 4294961152 }
  0xb7   : > { %3864 = dma.done.wait (%p4670_p7), [#allocation16], 3072  }
  0xb8   : > { %3866 = vsyncadd (%p4670_p7), [#allocation16], 4294964224  ;;  %p434_p5 = scmp.eq.s32.totalorder %s3877_s14, 0  ;;  %p435_p8 = scmp.eq.s32.totalorder %s3873_s13, 0 }
  0xba   : > { %p436_p9 = pnand %p435_p8, %p434_p5 }
  0xbb   : > { %v3357_v0 = vld [vmem:[#allocation9] sm:$0xff] (!%p436_p9)   ;;  %v3358_v1 = vld [vmem:[#allocation9 + $0x8] sm:$0xff] (!%p436_p9)   ;;  %v3359_v2 = vld [vmem:[#allocation9 + $0x10] sm:$0xff] (!%p436_p9)  }
  0xbc   : > { %442 = sbr.rel (%p436_p9) target bundleno = 450 (0x1c2), region = 88  ;;  %3048 = vmatprep.subr.bf16.mxu0 (!%p436_p9), %v3357_v0  ;;  %3208 = vmatprep.subr.bf16.mxu1 (!%p436_p9), %v3357_v0  ;;  %v3360_v3 = vld [vmem:[#allocation9 + $0x18] sm:$0xff] (!%p436_p9)   ;;  %v3365_v4 = vld [vmem:[#allocation6] sm:$0xff] (!%p436_p9)   ;;  %v3362_v7 = vld [vmem:[#allocation9 + $0x28] sm:$0xff] (!%p436_p9)  }
  0xbd   : > { %3049 = vmatpush3.bf16.msra.mxu0 (!%p436_p9), %v3357_v0  ;;  %3216 = vmatpush3.bf16.msra.mxu1 (!%p436_p9), %v3357_v0  ;;  %v3366_v5 = vld [vmem:[#allocation6 + $0x20] sm:$0xff] (!%p436_p9)   ;;  %v3363_v8 = vld [vmem:[#allocation9 + $0x30] sm:$0xff] (!%p436_p9)   ;;  %v3364_v9 = vld [vmem:[#allocation9 + $0x38] sm:$0xff] (!%p436_p9)  }
  0xbe   : > { %3050 = vmatprep.subr.bf16.mxu0 (!%p436_p9), %v3358_v1  ;;  %3209 = vmatprep.subr.bf16.mxu1 (!%p436_p9), %v3358_v1  ;;  %v3361_v6 = vld [vmem:[#allocation9 + $0x20] sm:$0xff] (!%p436_p9)   ;;  %v3367_v10 = vld [vmem:[#allocation6 + $0x8] sm:$0xff] (!%p436_p9)   ;;  %v3369_v12 = vld [vmem:[#allocation6 + $0x10] sm:$0xff] (!%p436_p9)  }
  0xbf   : > { %3064 = vmatprep.mubr.bf16.mxu0 (!%p436_p9), %v3365_v4  ;;  %3072 = vmatprep.mubr.bf16.mxu1 (!%p436_p9), %v3366_v5  ;;  %v3368_v11 = vld [vmem:[#allocation6 + $0x28] sm:$0xff] (!%p436_p9)   ;;  %v3370_v13 = vld [vmem:[#allocation6 + $0x30] sm:$0xff] (!%p436_p9)   ;;  %v3371_v14 = vld [vmem:[#allocation6 + $0x18] sm:$0xff] (!%p436_p9)  }
  0xc0   : > { %v3372_v15 = vld [vmem:[#allocation6 + $0x38] sm:$0xff] (!%p436_p9)   ;;  %v2825_v16 = vld [vmem:[%s4629_s2] ss:$0 sm:$0xff] (!%p436_p9) }
  0xc1   : > { %3051 = vmatpush3.bf16.msra.mxu0 (!%p436_p9), %v3358_v1  ;;  %3217 = vmatpush3.bf16.msra.mxu1 (!%p436_p9), %v3358_v1 }
  0xc2   : > { %3052 = vmatprep.subr.bf16.mxu0 (!%p436_p9), %v3359_v2  ;;  %3210 = vmatprep.subr.bf16.mxu1 (!%p436_p9), %v3359_v2 }
  0xc5   : > { %3053 = vmatpush3.bf16.msra.mxu0 %v3359_v2  ;;  %3218 = vmatpush3.bf16.msra.mxu1 %v3359_v2 }
  0xc6   : > { %3054 = vmatprep.subr.bf16.mxu0 %v3360_v3  ;;  %3211 = vmatprep.subr.bf16.mxu1 %v3360_v3 }
  0xc9   : > { %3055 = vmatpush3.bf16.msra.mxu0 %v3360_v3  ;;  %3219 = vmatpush3.bf16.msra.mxu1 %v3360_v3 }
  0xca   : > { %3056 = vmatprep.subr.bf16.mxu0 %v3361_v6  ;;  %3212 = vmatprep.subr.bf16.mxu1 %v3361_v6 }
  0xcd   : > { %3057 = vmatpush3.bf16.msra.mxu0 %v3361_v6  ;;  %3220 = vmatpush3.bf16.msra.mxu1 %v3361_v6 }
  0xce   : > { %3058 = vmatprep.subr.bf16.mxu0 %v3362_v7  ;;  %3213 = vmatprep.subr.bf16.mxu1 %v3362_v7 }
  0xd1   : > { %3059 = vmatpush3.bf16.msra.mxu0 %v3362_v7  ;;  %3221 = vmatpush3.bf16.msra.mxu1 %v3362_v7 }
  0xd2   : > { %3060 = vmatprep.subr.bf16.mxu0 %v3363_v8  ;;  %3214 = vmatprep.subr.bf16.mxu1 %v3363_v8 }
  0xd5   : > { %3061 = vmatpush3.bf16.msra.mxu0 %v3363_v8  ;;  %3222 = vmatpush3.bf16.msra.mxu1 %v3363_v8 }
  0xd6   : > { %3062 = vmatprep.subr.bf16.mxu0 %v3364_v9  ;;  %3215 = vmatprep.subr.bf16.mxu1 %v3364_v9 }
  0xd9   : > { %3063 = vmatpush3.bf16.msra.mxu0 %v3364_v9  ;;  %3223 = vmatpush3.bf16.msra.mxu1 %v3364_v9 }
  0xdc   : > { %3065 = vmatmul.mubr.bf16.vlgmr.msra.gmra.mrb[0].mxu0 %v3367_v10  ;;  %3073 = vmatmul.mubr.bf16.vlgmr.msra.gmra.mrb[0].mxu1 %v3368_v11 }
  0xdd   : > { %3068 = vmatprep.mubr.bf16.mxu0 %v3369_v12  ;;  %3076 = vmatprep.mubr.bf16.mxu1 %v3370_v13 }
  0xe4   : > { %3069 = vmatmul.mubr.bf16.gmra.mrb[4].mxu0 %v3371_v14  ;;  %3077 = vmatmul.mubr.bf16.gmra.mrb[4].mxu1 %v3372_v15 }
 0x1af   : > { %v3066_v17 = vpop.f32.mrb[0].mxu0  ;;  %v3074_v18 = vpop.f32.mrb[0].mxu1 }
 0x1b0   : > { %v621_v19 = vadd.f32 %v3066_v17, %v2825_v16  ;;  %v653_v20 = vadd.f32 %v3074_v18, %v2825_v16  ;;  %v612_v21 = vpop.f32.mrb[1].mxu0  ;;  %v644_v22 = vpop.f32.mrb[1].mxu1 }
 0x1b1   : > { %v613_v23 = vadd.f32 %v2825_v16, %v612_v21  ;;  %v645_v24 = vadd.f32 %v2825_v16, %v644_v22  ;;  %v3067_v25 = vpop.f32.mrb[2].mxu0  ;;  %v3075_v26 = vpop.f32.mrb[2].mxu1 }
 0x1b2   : > { %v677_v27 = vmax.f32 %v621_v19, 0.0  ;;  %v685_v28 = vmax.f32 %v653_v20, 0.0  ;;  %v624_v29 = vadd.f32 %v3067_v25, %v2825_v16  ;;  %v656_v30 = vadd.f32 %v3075_v26, %v2825_v16  ;;  %v615_v31 = vpop.f32.mrb[3].mxu0  ;;  %v647_v32 = vpop.f32.mrb[3].mxu1 }
 0x1b3   : > { %v675_v33 = vmax.f32 %v613_v23, 0.0  ;;  %v683_v34 = vmax.f32 %v645_v24, 0.0  ;;  %v616_v35 = vadd.f32 %v2825_v16, %v615_v31  ;;  %v648_v36 = vadd.f32 %v2825_v16, %v647_v32 }
 0x1b4   : > { %693 = vst [vmem:[#allocation17 + $0x10] sm:$0xff] %v677_v27  ;;  %701 = vst [vmem:[#allocation17 + $0x50] sm:$0xff] %v685_v28  ;;  %v678_v37 = vmax.f32 %v624_v29, 0.0  ;;  %v686_v38 = vmax.f32 %v656_v30, 0.0 }
 0x1b5   : > { %691 = vst [vmem:[#allocation17] sm:$0xff] %v675_v33  ;;  %699 = vst [vmem:[#allocation17 + $0x40] sm:$0xff] %v683_v34  ;;  %v676_v39 = vmax.f32 %v616_v35, 0.0  ;;  %v684_v40 = vmax.f32 %v648_v36, 0.0 }
 0x1b6   : > { %694 = vst [vmem:[#allocation17 + $0x18] sm:$0xff] %v678_v37  ;;  %v708_v41 = vpack.c.bf16 %v678_v37, %v677_v27  ;;  %702 = vst [vmem:[#allocation17 + $0x58] sm:$0xff] %v686_v38  ;;  %v712_v42 = vpack.c.bf16 %v686_v38, %v685_v28 }
 0x1b7   : > { %692 = vst [vmem:[#allocation17 + $0x8] sm:$0xff] %v676_v39  ;;  %v707_v43 = vpack.c.bf16 %v676_v39, %v675_v33  ;;  %700 = vst [vmem:[#allocation17 + $0x48] sm:$0xff] %v684_v40  ;;  %v711_v44 = vpack.c.bf16 %v684_v40, %v683_v34  ;;  %v3070_v45 = vpop.f32.mrb[4].mxu0  ;;  %v3078_v46 = vpop.f32.mrb[4].mxu1 }
 0x1b8   : > { %716 = vst [vmem:[#allocation3 + $0x8] sm:$0xff] %v708_v41  ;;  %720 = vst [vmem:[#allocation3 + $0x28] sm:$0xff] %v712_v42  ;;  %v637_v47 = vadd.f32 %v3070_v45, %v2825_v16  ;;  %v669_v48 = vadd.f32 %v3078_v46, %v2825_v16  ;;  %v628_v49 = vpop.f32.mrb[5].mxu0  ;;  %v660_v50 = vpop.f32.mrb[5].mxu1 }
 0x1b9   : > { %715 = vst [vmem:[#allocation3] sm:$0xff] %v707_v43  ;;  %719 = vst [vmem:[#allocation3 + $0x20] sm:$0xff] %v711_v44  ;;  %v629_v51 = vadd.f32 %v2825_v16, %v628_v49  ;;  %v661_v52 = vadd.f32 %v2825_v16, %v660_v50  ;;  %v3071_v53 = vpop.f32.mrb[6].mxu0  ;;  %v3079_v54 = vpop.f32.mrb[6].mxu1 }
 0x1ba   : > { %v681_v55 = vmax.f32 %v637_v47, 0.0  ;;  %v689_v56 = vmax.f32 %v669_v48, 0.0  ;;  %v640_v57 = vadd.f32 %v3071_v53, %v2825_v16  ;;  %v672_v58 = vadd.f32 %v3079_v54, %v2825_v16  ;;  %v631_v59 = vpop.f32.mrb[7].mxu0  ;;  %v663_v60 = vpop.f32.mrb[7].mxu1 }
 0x1bb   : > { %v679_v61 = vmax.f32 %v629_v51, 0.0  ;;  %v687_v62 = vmax.f32 %v661_v52, 0.0  ;;  %v632_v63 = vadd.f32 %v2825_v16, %v631_v59  ;;  %v664_v0 = vadd.f32 %v2825_v16, %v663_v60 }
 0x1bc   : > { %697 = vst [vmem:[#allocation17 + $0x30] sm:$0xff] %v681_v55  ;;  %705 = vst [vmem:[#allocation17 + $0x70] sm:$0xff] %v689_v56  ;;  %v682_v1 = vmax.f32 %v640_v57, 0.0  ;;  %v690_v2 = vmax.f32 %v672_v58, 0.0 }
 0x1bd   : > { %695 = vst [vmem:[#allocation17 + $0x20] sm:$0xff] %v679_v61  ;;  %703 = vst [vmem:[#allocation17 + $0x60] sm:$0xff] %v687_v62  ;;  %v680_v3 = vmax.f32 %v632_v63, 0.0  ;;  %v688_v4 = vmax.f32 %v664_v0, 0.0 }
 0x1be   : > { %698 = vst [vmem:[#allocation17 + $0x38] sm:$0xff] %v682_v1  ;;  %v710_v5 = vpack.c.bf16 %v682_v1, %v681_v55  ;;  %706 = vst [vmem:[#allocation17 + $0x78] sm:$0xff] %v690_v2  ;;  %v714_v6 = vpack.c.bf16 %v690_v2, %v689_v56 }
 0x1bf   : > { %696 = vst [vmem:[#allocation17 + $0x28] sm:$0xff] %v680_v3  ;;  %v709_v7 = vpack.c.bf16 %v680_v3, %v679_v61  ;;  %704 = vst [vmem:[#allocation17 + $0x68] sm:$0xff] %v688_v4  ;;  %v713_v8 = vpack.c.bf16 %v688_v4, %v687_v62 }
 0x1c0   : > { %718 = vst [vmem:[#allocation3 + $0x18] sm:$0xff] %v710_v5  ;;  %722 = vst [vmem:[#allocation3 + $0x38] sm:$0xff] %v714_v6 }
 0x1c1   : > { %717 = vst [vmem:[#allocation3 + $0x10] sm:$0xff] %v709_v7  ;;  %721 = vst [vmem:[#allocation3 + $0x30] sm:$0xff] %v713_v8 }
 0x1c2 PF: > { %726 = sbr.rel (!%p435_p8) target bundleno = 790 (0x316), region = 92  ;;  %v3373_v9 = vld [vmem:[#allocation12 + $0x4] ss:$12 sps:$4 sm:$0xff] (%p435_p8)   ;;  %v3901_v10 = vmov (%p435_p8), 0.0   ;;  %v3375_v11 = vld [vmem:[#allocation12 + $0x8] ss:$12 sps:$4 sm:$0xff] (%p435_p8)   ;;  %v785_v3 = vlaneseq (%p435_p8) }
 0x1c3   : > { %727 = vst [vmem:[#allocation2] sm:$0xff] (%p435_p8), %v3901_v10  ;;  %728 = vst [vmem:[#allocation2 + $0x8] sm:$0xff] (%p435_p8), %v3901_v10  ;;  %v3902_v12 = vmov (%p435_p8), 0   ;;  %928 = vmatprep.subr.bf16.mxu0 (%p435_p8), %v3373_v9  ;;  %v3376_v13 = vld [vmem:[#allocation12] ss:$12 sps:$4 sm:$0xff] (%p435_p8)   ;;  %3080 = vmatprep.subr.bf16.mxu1 (%p435_p8), %v3375_v11  ;;  %s4671_s10 = sld [smem:[#allocation27_spill]] (%p435_p8) }
 0x1c4   : > { %729 = vst [vmem:[#allocation2 + $0x10] sm:$0xff] (%p435_p8), %v3901_v10  ;;  %730 = vst [vmem:[#allocation2 + $0x18] sm:$0xff] (%p435_p8), %v3901_v10  ;;  %960 = vmatprep.mubr.bf16.mxu0 (%p435_p8), %v3902_v12  ;;  %v3377_v14 = vld [vmem:[#allocation12 + $0x1c] ss:$12 sps:$4 sm:$0xff] (%p435_p8)   ;;  %929 = vmatpush1.bf16.msra.mxu0 (%p435_p8), %v3376_v13  ;;  %v3379_v15 = vld [vmem:[#allocation12 + $0x20] ss:$12 sps:$4 sm:$0xff] (%p435_p8)  }
 0x1c5   : > { %731 = vst [vmem:[#allocation2 + $0x20] sm:$0xff] (%p435_p8), %v3901_v10  ;;  %732 = vst [vmem:[#allocation2 + $0x28] sm:$0xff] (%p435_p8), %v3901_v10  ;;  %3081 = vmatpush3.bf16.msra.mxu1 (%p435_p8), %v3375_v11  ;;  %v3380_v16 = vld [vmem:[#allocation12 + $0x18] ss:$12 sps:$4 sm:$0xff] (%p435_p8)   ;;  %930 = vmatprep.subr.bf16.mxu0 (%p435_p8), %v3377_v14  ;;  %v3381_v17 = vld [vmem:[#allocation12 + $0x34] ss:$12 sps:$4 sm:$0xff] (%p435_p8)  }
 0x1c6   : > { %733 = vst [vmem:[#allocation2 + $0x30] sm:$0xff] (%p435_p8), %v3901_v10  ;;  %734 = vst [vmem:[#allocation2 + $0x38] sm:$0xff] (%p435_p8), %v3901_v10  ;;  %3082 = vmatprep.subr.bf16.mxu1 (%p435_p8), %v3379_v15  ;;  %v3383_v18 = vld [vmem:[#allocation12 + $0x38] ss:$12 sps:$4 sm:$0xff] (%p435_p8)   ;;  %v3384_v19 = vld [vmem:[#allocation12 + $0x30] ss:$12 sps:$4 sm:$0xff] (%p435_p8)  }
 0x1c7   : > { %735 = vst [vmem:[#allocation2 + $0x40] sm:$0xff] (%p435_p8), %v3901_v10  ;;  %736 = vst [vmem:[#allocation2 + $0x48] sm:$0xff] (%p435_p8), %v3901_v10  ;;  %v3385_v20 = vld [vmem:[#allocation12 + $0x4c] ss:$12 sps:$4 sm:$0xff] (%p435_p8)   ;;  %v3387_v21 = vld [vmem:[#allocation12 + $0x50] ss:$12 sps:$4 sm:$0xff] (%p435_p8)  }
 0x1c8   : > { %737 = vst [vmem:[#allocation2 + $0x50] sm:$0xff] (%p435_p8), %v3901_v10  ;;  %738 = vst [vmem:[#allocation2 + $0x58] sm:$0xff] (%p435_p8), %v3901_v10  ;;  %931 = vmatpush1.bf16.msra.mxu0 (%p435_p8), %v3380_v16  ;;  %v3388_v22 = vld [vmem:[#allocation12 + $0x48] ss:$12 sps:$4 sm:$0xff] (%p435_p8)   ;;  %v3389_v23 = vld [vmem:[#allocation12 + $0x64] ss:$12 sps:$4 sm:$0xff] (%p435_p8)  }
 0x1c9   : > { %739 = vst [vmem:[#allocation2 + $0x60] sm:$0xff] %v3901_v10  ;;  %740 = vst [vmem:[#allocation2 + $0x68] sm:$0xff] %v3901_v10  ;;  %3083 = vmatpush3.bf16.msra.mxu1 %v3379_v15  ;;  %932 = vmatprep.subr.bf16.mxu0 %v3381_v17  ;;  %v3391_v24 = vld [vmem:[#allocation12 + $0x68] ss:$12 sps:$4 sm:$0xff]   ;;  %v3392_v25 = vld [vmem:[#allocation12 + $0x60] ss:$12 sps:$4 sm:$0xff]  }
 0x1ca   : > { %741 = vst [vmem:[#allocation2 + $0x70] sm:$0xff] %v3901_v10  ;;  %742 = vst [vmem:[#allocation2 + $0x78] sm:$0xff] %v3901_v10  ;;  %3084 = vmatprep.subr.bf16.mxu1 %v3383_v18  ;;  %v3393_v26 = vld [vmem:[#allocation12 + $0x7c] ss:$12 sps:$4 sm:$0xff]   ;;  %v3395_v27 = vld [vmem:[#allocation12 + $0x80] ss:$12 sps:$4 sm:$0xff]  }
 0x1cb   : > { %v4183_v28 = vld [vmem:[#allocation3] sm:$0xff]  ;;  %v3400_v32 = vld [vmem:[#allocation12 + $0x90] ss:$12 sps:$4 sm:$0xff]   ;;  %v3401_v33 = vld [vmem:[#allocation12 + $0xac] ss:$12 sps:$4 sm:$0xff]   ;;  %v4234_v4 = vshrl.u32 %v785_v3, 7 }
 0x1cc   : > { %933 = vmatpush1.bf16.msra.mxu0 %v3384_v19  ;;  %3096 = vmatprep.mubr.bf16.mxu1 %v4183_v28  ;;  %v3396_v29 = vld [vmem:[#allocation12 + $0x78] ss:$12 sps:$4 sm:$0xff]   ;;  %v3397_v30 = vld [vmem:[#allocation12 + $0x94] ss:$12 sps:$4 sm:$0xff]   ;;  %v3403_v34 = vld [vmem:[#allocation12 + $0xb0] ss:$12 sps:$4 sm:$0xff]  }
 0x1cd   : > { %3085 = vmatpush3.bf16.msra.mxu1 %v3383_v18  ;;  %934 = vmatprep.subr.bf16.mxu0 %v3385_v20  ;;  %v3399_v31 = vld [vmem:[#allocation12 + $0x98] ss:$12 sps:$4 sm:$0xff]   ;;  %v3404_v35 = vld [vmem:[#allocation12 + $0xa8] ss:$12 sps:$4 sm:$0xff]   ;;  %v3405_v39 = vld [vmem:[#allocation15] ss:$12 sps:$4 sm:$0xff]  }
 0x1ce   : > { %3086 = vmatprep.subr.bf16.mxu1 %v3387_v21  ;;  %v3407_v36 = vld [vmem:[#allocation15 + $0x4] ss:$12 sps:$4 sm:$0xff]   ;;  %v3408_v37 = vld [vmem:[#allocation15 + $0x8] ss:$12 sps:$4 sm:$0xff]   ;;  %v3415_v41 = vld [vmem:[#allocation15 + $0x20] ss:$12 sps:$4 sm:$0xff]  }
 0x1cf   : > { %v4186_v38 = vld [vmem:[#allocation3 + $0x8] sm:$0xff]  ;;  %v3409_v42 = vld [vmem:[#allocation15 + $0x18] ss:$12 sps:$4 sm:$0xff]   ;;  %v4190_v43 = vld [vmem:[#allocation3 + $0x10] sm:$0xff]  ;;  %v787_v5 = vsub.s32 0, %v4234_v4  ;;  %v795_v6 = vsub.s32 2, %v4234_v4 }
 0x1d0   : > { %935 = vmatpush1.bf16.msra.mxu0 %v3388_v22  ;;  %v3411_v40 = vld [vmem:[#allocation15 + $0x1c] ss:$12 sps:$4 sm:$0xff]   ;;  %v3414_v44 = vld [vmem:[#allocation15 + $0x34] ss:$12 sps:$4 sm:$0xff]   ;;  %v3422_v45 = vld [vmem:[#allocation15 + $0x38] ss:$12 sps:$4 sm:$0xff]  }
 0x1d1   : > { %3087 = vmatpush3.bf16.msra.mxu1 %v3387_v21  ;;  %936 = vmatprep.subr.bf16.mxu0 %v3389_v23  ;;  %v4194_v46 = vld [vmem:[#allocation3 + $0x18] sm:$0xff]  ;;  %v4196_v49 = vld [vmem:[#allocation3 + $0x20] sm:$0xff]  ;;  %v3416_v51 = vld [vmem:[#allocation15 + $0x48] ss:$12 sps:$4 sm:$0xff]   ;;  %v791_v8 = vsub.s32 1, %v4234_v4 }
 0x1d2   : > { %3088 = vmatprep.subr.bf16.mxu1 %v3391_v24  ;;  %v3412_v47 = vld [vmem:[#allocation15 + $0x30] ss:$12 sps:$4 sm:$0xff]   ;;  %v3418_v48 = vld [vmem:[#allocation15 + $0x4c] ss:$12 sps:$4 sm:$0xff]   ;;  %v3433_v57 = vld [vmem:[#allocation15 + $0x68] ss:$12 sps:$4 sm:$0xff]  }
 0x1d3   : > { %v3429_v50 = vld [vmem:[#allocation15 + $0x50] ss:$12 sps:$4 sm:$0xff]   ;;  %v4202_v53 = vld [vmem:[#allocation3 + $0x28] sm:$0xff]  ;;  %v3423_v58 = vld [vmem:[#allocation15 + $0x78] ss:$12 sps:$4 sm:$0xff]  }
 0x1d4   : > { %937 = vmatpush1.bf16.msra.mxu0 %v3392_v25  ;;  %v3421_v52 = vld [vmem:[#allocation15 + $0x64] ss:$12 sps:$4 sm:$0xff]   ;;  %v3419_v54 = vld [vmem:[#allocation15 + $0x60] ss:$12 sps:$4 sm:$0xff]   ;;  %v3425_v55 = vld [vmem:[#allocation15 + $0x7c] ss:$12 sps:$4 sm:$0xff]  }
 0x1d5   : > { %3089 = vmatpush3.bf16.msra.mxu1 %v3391_v24  ;;  %938 = vmatprep.subr.bf16.mxu0 %v3393_v26  ;;  %v749_v56 = vld [vmem:[#allocation3 + $0x30] sm:$0xff]  ;;  %v3434_v59 = vld [vmem:[#allocation15 + $0x80] ss:$12 sps:$4 sm:$0xff]   ;;  %v750_v61 = vld [vmem:[#allocation3 + $0x38] sm:$0xff] }
 0x1d6   : > { %3090 = vmatprep.subr.bf16.mxu1 %v3395_v27  ;;  %v3428_v60 = vld [vmem:[#allocation15 + $0x94] ss:$12 sps:$4 sm:$0xff]   ;;  %v3426_v62 = vld [vmem:[#allocation15 + $0x90] ss:$12 sps:$4 sm:$0xff]   ;;  %v3432_v63 = vld [vmem:[#allocation15 + $0xac] ss:$12 sps:$4 sm:$0xff]  }
 0x1d7   : > { %v3435_v0 = vld [vmem:[#allocation15 + $0x98] ss:$12 sps:$4 sm:$0xff]   ;;  %v3430_v1 = vld [vmem:[#allocation15 + $0xa8] ss:$12 sps:$4 sm:$0xff]   ;;  %v3436_v2 = vld [vmem:[#allocation15 + $0xb0] ss:$12 sps:$4 sm:$0xff]  }
 0x1d8   : > { %939 = vmatpush1.bf16.msra.mxu0 %v3396_v29  ;;  %v783_v7 = vld [vmem:[%s4632_s5] sm:$0x7] }
 0x1d9   : > { %3091 = vmatpush3.bf16.msra.mxu1 %v3395_v27  ;;  %940 = vmatprep.subr.bf16.mxu0 %v3397_v30  ;;  %v4244_v9 = vrot.slane %v783_v7, %v787_v5  ;;  %v4248_v10 = vrot.slane %v783_v7, %v795_v6  ;;  %v4252_v13 = vrot.slane %v783_v7, %v791_v8 }
 0x1da   : > { %3092 = vmatprep.subr.bf16.mxu1 %v3399_v31 }
 0x1dc   : > { %941 = vmatpush1.bf16.msra.mxu0 %v3400_v32 }
 0x1dd   : > { %3093 = vmatpush3.bf16.msra.mxu1 %v3399_v31  ;;  %942 = vmatprep.subr.bf16.mxu0 %v3401_v33 }
 0x1de   : > { %3094 = vmatprep.subr.bf16.mxu1 %v3403_v34 }
 0x1e0   : > { %943 = vmatpush1.bf16.msra.mxu0 %v3404_v35 }
 0x1e1   : > { %3095 = vmatpush3.bf16.msra.mxu1 %v3403_v34  ;;  %3112 = vmatprep.subr.bf16.mxu0 %v3408_v37 }
 0x1e2   : > { %1365 = vmatprep.subr.bf16.mxu1 %v3407_v36 }
 0x1e3   : > { %961 = vmatmul.mubr.bf16.vlgmr.msra.gmra.mrb[0].mxu0 %v4183_v28 }
 0x1e4   : > { %3097 = vmatmul.mubr.bf16.vlgmr.msra.gmra.mrb[0].mxu1 %v4186_v38  ;;  %3113 = vmatpush3.bf16.msra.mxu0 %v3408_v37 }
 0x1e5   : > { %1366 = vmatpush1.bf16.msra.mxu1 %v3405_v39  ;;  %970 = vmatprep.mubr.bf16.mxu0 %v3902_v12 }
 0x1e6   : > { %1367 = vmatprep.subr.bf16.mxu1 %v3411_v40  ;;  %3100 = vmatprep.mubr.bf16.mxu1 %v4190_v43 }
 0x1e7   : > { %3114 = vmatprep.subr.bf16.mxu0 %v3415_v41 }
 0x1e8   : > { %3115 = vmatpush3.bf16.msra.mxu0 %v3415_v41 }
 0x1e9   : > { %1368 = vmatpush1.bf16.msra.mxu1 %v3409_v42  ;;  %3116 = vmatprep.subr.bf16.mxu0 %v3422_v45 }
 0x1ea   : > { %1369 = vmatprep.subr.bf16.mxu1 %v3414_v44 }
 0x1eb   : > { %971 = vmatmul.mubr.bf16.gmra.mrb[4].mxu0 %v4186_v38 }
 0x1ec   : > { %3101 = vmatmul.mubr.bf16.gmra.mrb[4].mxu1 %v4194_v46  ;;  %980 = vmatprep.mubr.bf16.mxu0 %v3902_v12 }
 0x1ed   : > { %1370 = vmatpush1.bf16.msra.mxu1 %v3412_v47  ;;  %3104 = vmatprep.mubr.bf16.mxu1 %v4196_v49 }
 0x1ee   : > { %1371 = vmatprep.subr.bf16.mxu1 %v3418_v48  ;;  %3117 = vmatpush3.bf16.msra.mxu0 %v3422_v45 }
 0x1ef   : > { %3118 = vmatprep.subr.bf16.mxu0 %v3429_v50 }
 0x1f1   : > { %1372 = vmatpush1.bf16.msra.mxu1 %v3416_v51 }
 0x1f2   : > { %1373 = vmatprep.subr.bf16.mxu1 %v3421_v52  ;;  %3119 = vmatpush3.bf16.msra.mxu0 %v3429_v50 }
 0x1f3   : > { %981 = vmatmul.mubr.bf16.gmra.mrb[8].mxu0 %v4190_v43  ;;  %3120 = vmatprep.subr.bf16.mxu0 %v3433_v57 }
 0x1f4   : > { %3105 = vmatmul.mubr.bf16.gmra.mrb[8].mxu1 %v4202_v53  ;;  %990 = vmatprep.mubr.bf16.mxu0 %v3902_v12 }
 0x1f5   : > { %1374 = vmatpush1.bf16.msra.mxu1 %v3419_v54  ;;  %3108 = vmatprep.mubr.bf16.mxu1 %v749_v56 }
 0x1f6   : > { %1375 = vmatprep.subr.bf16.mxu1 %v3425_v55  ;;  %3121 = vmatpush3.bf16.msra.mxu0 %v3433_v57 }
 0x1f7   : > { %3122 = vmatprep.subr.bf16.mxu0 %v3434_v59 }
 0x1f9   : > { %1376 = vmatpush1.bf16.msra.mxu1 %v3423_v58 }
 0x1fa   : > { %1377 = vmatprep.subr.bf16.mxu1 %v3428_v60  ;;  %3123 = vmatpush3.bf16.msra.mxu0 %v3434_v59 }
 0x1fb   : > { %991 = vmatmul.mubr.bf16.gmra.mrb[12].mxu0 %v4194_v46  ;;  %3124 = vmatprep.subr.bf16.mxu0 %v3435_v0 }
 0x1fc   : > { %3109 = vmatmul.mubr.bf16.gmra.mrb[12].mxu1 %v750_v61  ;;  %1000 = vmatprep.mubr.bf16.mxu0 %v3902_v12 }
 0x1fd   : > { %1378 = vmatpush1.bf16.msra.mxu1 %v3426_v62  ;;  %1397 = vmatprep.mubr.bf16.mxu1 %v3902_v12 }
 0x1fe   : > { %1379 = vmatprep.subr.bf16.mxu1 %v3432_v63  ;;  %3125 = vmatpush3.bf16.msra.mxu0 %v3435_v0 }
 0x1ff   : > { %3126 = vmatprep.subr.bf16.mxu0 %v3436_v2 }
 0x201   : > { %1380 = vmatpush1.bf16.msra.mxu1 %v3430_v1 }
 0x202   : > { %3127 = vmatpush3.bf16.msra.mxu0 %v3436_v2 }
 0x203   : > { %1001 = vmatmul.mubr.bf16.gmra.mrb[16].mxu0 %v4196_v49 }
 0x204   : > { %1398 = vmatmul.mubr.bf16.vlgmr.msra.gmra.mrb[16].mxu1 %v4183_v28  ;;  %1010 = vmatprep.mubr.bf16.mxu0 %v3902_v12 }
 0x205   : > { %1407 = vmatprep.mubr.bf16.mxu1 %v3902_v12 }
 0x20b   : > { %1011 = vmatmul.mubr.bf16.gmra.mrb[20].mxu0 %v4202_v53 }
 0x20c   : > { %1408 = vmatmul.mubr.bf16.gmra.mrb[20].mxu1 %v4186_v38  ;;  %1020 = vmatprep.mubr.bf16.mxu0 %v3902_v12 }
 0x20d   : > { %1417 = vmatprep.mubr.bf16.mxu1 %v3902_v12 }
 0x213   : > { %1021 = vmatmul.mubr.bf16.gmra.mrb[24].mxu0 %v749_v56 }
 0x214   : > { %1418 = vmatmul.mubr.bf16.gmra.mrb[24].mxu1 %v4190_v43  ;;  %1030 = vmatprep.mubr.bf16.mxu0 %v3902_v12 }
 0x215   : > { %1427 = vmatprep.mubr.bf16.mxu1 %v3902_v12 }
 0x21b   : > { %1031 = vmatmul.mubr.bf16.gmra.mrb[28].mxu0 %v750_v61 }
 0x21c   : > { %1428 = vmatmul.mubr.bf16.gmra.mrb[28].mxu1 %v4194_v46  ;;  %3128 = vmatprep.mubr.bf16.mxu0 %v4183_v28 }
 0x21d   : > { %1437 = vmatprep.mubr.bf16.mxu1 %v3902_v12 }
 0x223   : > { %3129 = vmatmul.mubr.bf16.vlgmr.msra.gmra.mrb[32].mxu0 %v4186_v38 }
 0x224   : > { %1438 = vmatmul.mubr.bf16.gmra.mrb[32].mxu1 %v4196_v49  ;;  %3132 = vmatprep.mubr.bf16.mxu0 %v4190_v43 }
 0x225   : > { %1447 = vmatprep.mubr.bf16.mxu1 %v3902_v12 }
 0x22b   : > { %3133 = vmatmul.mubr.bf16.gmra.mrb[36].mxu0 %v4194_v46 }
 0x22c   : > { %1448 = vmatmul.mubr.bf16.gmra.mrb[36].mxu1 %v4202_v53  ;;  %3136 = vmatprep.mubr.bf16.mxu0 %v4196_v49 }
 0x22d   : > { %1457 = vmatprep.mubr.bf16.mxu1 %v3902_v12 }
 0x233   : > { %3137 = vmatmul.mubr.bf16.gmra.mrb[40].mxu0 %v4202_v53 }
 0x234   : > { %1458 = vmatmul.mubr.bf16.gmra.mrb[40].mxu1 %v749_v56  ;;  %3140 = vmatprep.mubr.bf16.mxu0 %v749_v56 }
 0x235   : > { %1467 = vmatprep.mubr.bf16.mxu1 %v3902_v12 }
 0x23b   : > { %3141 = vmatmul.mubr.bf16.gmra.mrb[44].mxu0 %v750_v61 }
 0x23c   : > { %1468 = vmatmul.mubr.bf16.gmra.mrb[44].mxu1 %v750_v61 }
 0x2b6   : > { %v962_v11 = vpop.f32.mrb[0].mxu0 }
 0x2b7   : > { %v3098_v12 = vpop.f32.mrb[0].mxu1  ;;  %v964_v14 = vpop.f32.mrb[1].mxu0  ;;  %v963_v18 = vadd.f32 %v962_v11, %v4244_v9 }
 0x2b8   : > { %v1075_v15 = vpop.f32.mrb[1].mxu1  ;;  %v966_v16 = vpop.f32.mrb[2].mxu0  ;;  %v1084_v19 = vadd.f32 %v3098_v12, %v4248_v10  ;;  %v965_v24 = vadd.f32 %v964_v14, %v4252_v13 }
 0x2b9   : > { %v3099_v17 = vpop.f32.mrb[2].mxu1  ;;  %v967_v20 = vadd.f32 %v966_v16, %v4244_v9  ;;  %v968_v22 = vpop.f32.mrb[3].mxu0  ;;  %v1076_v25 = vadd.f32 %v1075_v15, %v4248_v10 }
 0x2ba   : > { %v1087_v21 = vadd.f32 %v3099_v17, %v4248_v10  ;;  %v1078_v23 = vpop.f32.mrb[3].mxu1  ;;  %v969_v26 = vadd.f32 %v968_v22, %v4252_v13 }
 0x2bb   : > { %v1079_v27 = vadd.f32 %v1078_v23, %v4248_v10  ;;  %v1138_v28 = vpack.c.bf16 %v967_v20, %v963_v18 }
 0x2bc   : > { %v1172_v29 = vpack.c.bf16 %v1087_v21, %v1084_v19  ;;  %v1154_v30 = vpack.c.bf16 %v969_v26, %v965_v24  ;;  %v4281_v21 = vld [vmem:[%s4671_s10] sm:$0x7] }
 0x2bd   : > { %v1171_v31 = vpack.c.bf16 %v1079_v27, %v1076_v25  ;;  %1146 = vst [vmem:[#allocation4] sm:$0xff] %v1138_v28 }
 0x2be   : > { %1181 = vst [vmem:[#allocation4 + $0x88] sm:$0xff] %v1172_v29  ;;  %1163 = vst [vmem:[#allocation4 + $0x40] sm:$0xff] %v1154_v30  ;;  %v972_v32 = vpop.f32.mrb[4].mxu0 }
 0x2bf   : > { %1180 = vst [vmem:[#allocation4 + $0x80] sm:$0xff] %v1171_v31  ;;  %v3102_v33 = vpop.f32.mrb[4].mxu1  ;;  %v974_v34 = vpop.f32.mrb[5].mxu0  ;;  %v973_v38 = vadd.f32 %v972_v32, %v4244_v9 }
 0x2c0   : > { %v1091_v35 = vpop.f32.mrb[5].mxu1  ;;  %v976_v36 = vpop.f32.mrb[6].mxu0  ;;  %v1100_v39 = vadd.f32 %v3102_v33, %v4248_v10  ;;  %v975_v44 = vadd.f32 %v974_v34, %v4252_v13  ;;  %v4294_v34 = vrot.slane %v4281_v21, %v787_v5 }
 0x2c1   : > { %v3103_v37 = vpop.f32.mrb[6].mxu1  ;;  %v977_v40 = vadd.f32 %v976_v36, %v4244_v9  ;;  %v978_v42 = vpop.f32.mrb[7].mxu0  ;;  %v1092_v45 = vadd.f32 %v1091_v35, %v4248_v10 }
 0x2c2   : > { %v1103_v41 = vadd.f32 %v3103_v37, %v4248_v10  ;;  %v1094_v43 = vpop.f32.mrb[7].mxu1  ;;  %v979_v46 = vadd.f32 %v978_v42, %v4252_v13  ;;  %v4299_v37 = vrot.slane %v4281_v21, %v791_v8 }
 0x2c3   : > { %v1095_v47 = vadd.f32 %v1094_v43, %v4248_v10  ;;  %v1139_v48 = vpack.c.bf16 %v977_v40, %v973_v38 }
 0x2c4   : > { %v1174_v49 = vpack.c.bf16 %v1103_v41, %v1100_v39  ;;  %v1155_v50 = vpack.c.bf16 %v979_v46, %v975_v44 }
 0x2c5   : > { %v1173_v51 = vpack.c.bf16 %v1095_v47, %v1092_v45  ;;  %1147 = vst [vmem:[#allocation4 + $0x8] sm:$0xff] %v1139_v48 }
 0x2c6   : > { %1183 = vst [vmem:[#allocation4 + $0x98] sm:$0xff] %v1174_v49  ;;  %1164 = vst [vmem:[#allocation4 + $0x48] sm:$0xff] %v1155_v50  ;;  %v982_v52 = vpop.f32.mrb[8].mxu0 }
 0x2c7   : > { %1182 = vst [vmem:[#allocation4 + $0x90] sm:$0xff] %v1173_v51  ;;  %v3106_v53 = vpop.f32.mrb[8].mxu1  ;;  %v984_v54 = vpop.f32.mrb[9].mxu0  ;;  %v983_v58 = vadd.f32 %v982_v52, %v4244_v9 }
 0x2c8   : > { %v1107_v55 = vpop.f32.mrb[9].mxu1  ;;  %v986_v56 = vpop.f32.mrb[10].mxu0  ;;  %v1116_v59 = vadd.f32 %v3106_v53, %v4248_v10  ;;  %v985_v0 = vadd.f32 %v984_v54, %v4252_v13 }
 0x2c9   : > { %v3107_v57 = vpop.f32.mrb[10].mxu1  ;;  %v987_v60 = vadd.f32 %v986_v56, %v4244_v9  ;;  %v988_v62 = vpop.f32.mrb[11].mxu0  ;;  %v1108_v1 = vadd.f32 %v1107_v55, %v4248_v10 }
 0x2ca   : > { %v1119_v61 = vadd.f32 %v3107_v57, %v4248_v10  ;;  %v1110_v63 = vpop.f32.mrb[11].mxu1  ;;  %v989_v2 = vadd.f32 %v988_v62, %v4252_v13 }
 0x2cb   : > { %v1111_v3 = vadd.f32 %v1110_v63, %v4248_v10  ;;  %v1140_v7 = vpack.c.bf16 %v987_v60, %v983_v58 }
 0x2cc   : > { %v1176_v11 = vpack.c.bf16 %v1119_v61, %v1116_v59  ;;  %v1156_v12 = vpack.c.bf16 %v989_v2, %v985_v0 }
 0x2cd   : > { %v1175_v14 = vpack.c.bf16 %v1111_v3, %v1108_v1  ;;  %1148 = vst [vmem:[#allocation4 + $0x10] sm:$0xff] %v1140_v7 }
 0x2ce   : > { %1185 = vst [vmem:[#allocation4 + $0xa8] sm:$0xff] %v1176_v11  ;;  %1165 = vst [vmem:[#allocation4 + $0x50] sm:$0xff] %v1156_v12  ;;  %v992_v15 = vpop.f32.mrb[12].mxu0 }
 0x2cf   : > { %1184 = vst [vmem:[#allocation4 + $0xa0] sm:$0xff] %v1175_v14  ;;  %v3110_v16 = vpop.f32.mrb[12].mxu1  ;;  %v994_v17 = vpop.f32.mrb[13].mxu0  ;;  %v993_v22 = vadd.f32 %v992_v15, %v4244_v9 }
 0x2d0   : > { %v1123_v18 = vpop.f32.mrb[13].mxu1  ;;  %v996_v19 = vpop.f32.mrb[14].mxu0  ;;  %v1132_v23 = vadd.f32 %v3110_v16, %v4248_v10  ;;  %v995_v28 = vadd.f32 %v994_v17, %v4252_v13 }
 0x2d1   : > { %v3111_v20 = vpop.f32.mrb[14].mxu1  ;;  %v997_v24 = vadd.f32 %v996_v19, %v4244_v9  ;;  %v998_v26 = vpop.f32.mrb[15].mxu0  ;;  %v1124_v29 = vadd.f32 %v1123_v18, %v4248_v10 }
 0x2d2   : > { %v1135_v25 = vadd.f32 %v3111_v20, %v4248_v10  ;;  %v1126_v27 = vpop.f32.mrb[15].mxu1  ;;  %v999_v30 = vadd.f32 %v998_v26, %v4252_v13 }
 0x2d3   : > { %v1127_v31 = vadd.f32 %v1126_v27, %v4248_v10  ;;  %v1141_v32 = vpack.c.bf16 %v997_v24, %v993_v22 }
 0x2d4   : > { %v1178_v33 = vpack.c.bf16 %v1135_v25, %v1132_v23  ;;  %v1157_v35 = vpack.c.bf16 %v999_v30, %v995_v28 }
 0x2d5   : > { %v1177_v36 = vpack.c.bf16 %v1127_v31, %v1124_v29  ;;  %1149 = vst [vmem:[#allocation4 + $0x18] sm:$0xff] %v1141_v32 }
 0x2d6   : > { %1187 = vst [vmem:[#allocation4 + $0xb8] sm:$0xff] %v1178_v33  ;;  %1166 = vst [vmem:[#allocation4 + $0x58] sm:$0xff] %v1157_v35  ;;  %v1002_v38 = vpop.f32.mrb[16].mxu0 }
 0x2d7   : > { %1186 = vst [vmem:[#allocation4 + $0xb0] sm:$0xff] %v1177_v36  ;;  %v1399_v10 = vpop.f32.mrb[16].mxu1  ;;  %v1004_v40 = vpop.f32.mrb[17].mxu0  ;;  %v1003_v44 = vadd.f32 %v1002_v38, %v4244_v9 }
 0x2d8   : > { %v1400_v39 = vadd.f32 %v1399_v10, %v4294_v34  ;;  %v1401_v41 = vpop.f32.mrb[17].mxu1  ;;  %v1006_v42 = vpop.f32.mrb[18].mxu0  ;;  %v1005_v48 = vadd.f32 %v1004_v40, %v4252_v13 }
 0x2d9   : > { %v1402_v5 = vadd.f32 %v1401_v41, %v4299_v37  ;;  %v1403_v43 = vpop.f32.mrb[18].mxu1  ;;  %v1007_v8 = vadd.f32 %v1006_v42, %v4244_v9  ;;  %v1008_v46 = vpop.f32.mrb[19].mxu0 }
 0x2da   : > { %1575 = vst [vmem:[#allocation5] sm:$0xff] %v1400_v39  ;;  %v1404_v45 = vadd.f32 %v1403_v43, %v4294_v34  ;;  %v1405_v47 = vpop.f32.mrb[19].mxu1  ;;  %v1009_v49 = vadd.f32 %v1008_v46, %v4252_v13 }
 0x2db   : > { %1576 = vst [vmem:[#allocation5 + $0x8] sm:$0xff] %v1402_v5  ;;  %v1406_v50 = vadd.f32 %v1405_v47, %v4299_v37  ;;  %v1142_v51 = vpack.c.bf16 %v1007_v8, %v1003_v44 }
 0x2dc   : > { %1578 = vst [vmem:[#allocation5 + $0x18] sm:$0xff] %v1404_v45  ;;  %v1158_v52 = vpack.c.bf16 %v1009_v49, %v1005_v48  ;;  %v4336_v49 = vrot.slane %v4281_v21, %v795_v6 }
 0x2dd   : > { %1579 = vst [vmem:[#allocation5 + $0x20] sm:$0xff] %v1406_v50  ;;  %1150 = vst [vmem:[#allocation4 + $0x20] sm:$0xff] %v1142_v51 }
 0x2de   : > { %1167 = vst [vmem:[#allocation4 + $0x60] sm:$0xff] %v1158_v52  ;;  %v1012_v53 = vpop.f32.mrb[20].mxu0 }
 0x2df   : > { %v1409_v54 = vpop.f32.mrb[20].mxu1  ;;  %v1014_v56 = vpop.f32.mrb[21].mxu0  ;;  %v1013_v61 = vadd.f32 %v1012_v53, %v4244_v9 }
 0x2e0   : > { %v1410_v55 = vadd.f32 %v1409_v54, %v4294_v34  ;;  %v1411_v57 = vpop.f32.mrb[21].mxu1  ;;  %v1016_v59 = vpop.f32.mrb[22].mxu0  ;;  %v1015_v2 = vadd.f32 %v1014_v56, %v4252_v13 }
 0x2e1   : > { %v1412_v58 = vadd.f32 %v1411_v57, %v4299_v37  ;;  %v1413_v60 = vpop.f32.mrb[22].mxu1  ;;  %v1017_v62 = vadd.f32 %v1016_v59, %v4244_v9  ;;  %v1018_v0 = vpop.f32.mrb[23].mxu0 }
 0x2e2   : > { %1581 = vst [vmem:[#allocation5 + $0x30] sm:$0xff] %v1410_v55  ;;  %v1414_v63 = vadd.f32 %v1413_v60, %v4294_v34  ;;  %v1415_v1 = vpop.f32.mrb[23].mxu1  ;;  %v1019_v3 = vadd.f32 %v1018_v0, %v4252_v13 }
 0x2e3   : > { %1582 = vst [vmem:[#allocation5 + $0x38] sm:$0xff] %v1412_v58  ;;  %v1416_v7 = vadd.f32 %v1415_v1, %v4299_v37  ;;  %v1143_v11 = vpack.c.bf16 %v1017_v62, %v1013_v61 }
 0x2e4   : > { %1584 = vst [vmem:[#allocation5 + $0x48] sm:$0xff] %v1414_v63  ;;  %v1159_v12 = vpack.c.bf16 %v1019_v3, %v1015_v2 }
 0x2e5   : > { %1585 = vst [vmem:[#allocation5 + $0x50] sm:$0xff] %v1416_v7  ;;  %1151 = vst [vmem:[#allocation4 + $0x28] sm:$0xff] %v1143_v11 }
 0x2e6   : > { %1168 = vst [vmem:[#allocation4 + $0x68] sm:$0xff] %v1159_v12  ;;  %v1022_v14 = vpop.f32.mrb[24].mxu0 }
 0x2e7   : > { %v1419_v15 = vpop.f32.mrb[24].mxu1  ;;  %v1024_v17 = vpop.f32.mrb[25].mxu0  ;;  %v1023_v23 = vadd.f32 %v1022_v14, %v4244_v9 }
 0x2e8   : > { %v1420_v16 = vadd.f32 %v1419_v15, %v4294_v34  ;;  %v1421_v18 = vpop.f32.mrb[25].mxu1  ;;  %v1026_v20 = vpop.f32.mrb[26].mxu0  ;;  %v1025_v28 = vadd.f32 %v1024_v17, %v4252_v13 }
 0x2e9   : > { %v1422_v19 = vadd.f32 %v1421_v18, %v4299_v37  ;;  %v1423_v22 = vpop.f32.mrb[26].mxu1  ;;  %v1027_v24 = vadd.f32 %v1026_v20, %v4244_v9  ;;  %v1028_v26 = vpop.f32.mrb[27].mxu0 }
 0x2ea   : > { %1587 = vst [vmem:[#allocation5 + $0x60] sm:$0xff] %v1420_v16  ;;  %v1424_v25 = vadd.f32 %v1423_v22, %v4294_v34  ;;  %v1425_v27 = vpop.f32.mrb[27].mxu1  ;;  %v1029_v29 = vadd.f32 %v1028_v26, %v4252_v13 }
 0x2eb   : > { %1588 = vst [vmem:[#allocation5 + $0x68] sm:$0xff] %v1422_v19  ;;  %v1426_v30 = vadd.f32 %v1425_v27, %v4299_v37  ;;  %v1144_v31 = vpack.c.bf16 %v1027_v24, %v1023_v23 }
 0x2ec   : > { %1590 = vst [vmem:[#allocation5 + $0x78] sm:$0xff] %v1424_v25  ;;  %v1160_v32 = vpack.c.bf16 %v1029_v29, %v1025_v28 }
 0x2ed   : > { %1591 = vst [vmem:[#allocation5 + $0x80] sm:$0xff] %v1426_v30  ;;  %1152 = vst [vmem:[#allocation4 + $0x30] sm:$0xff] %v1144_v31 }
 0x2ee   : > { %1169 = vst [vmem:[#allocation4 + $0x70] sm:$0xff] %v1160_v32  ;;  %v1032_v33 = vpop.f32.mrb[28].mxu0 }
 0x2ef   : > { %v1429_v35 = vpop.f32.mrb[28].mxu1  ;;  %v1034_v38 = vpop.f32.mrb[29].mxu0  ;;  %v1033_v5 = vadd.f32 %v1032_v33, %v4244_v9 }
 0x2f0   : > { %v1430_v36 = vadd.f32 %v1429_v35, %v4294_v34  ;;  %v1431_v10 = vpop.f32.mrb[29].mxu1  ;;  %v1036_v40 = vpop.f32.mrb[30].mxu0  ;;  %v1035_v45 = vadd.f32 %v1034_v38, %v4252_v13 }
 0x2f1   : > { %v1432_v39 = vadd.f32 %v1431_v10, %v4299_v37  ;;  %v1433_v41 = vpop.f32.mrb[30].mxu1  ;;  %v1037_v42 = vadd.f32 %v1036_v40, %v4244_v9  ;;  %v1038_v44 = vpop.f32.mrb[31].mxu0 }
 0x2f2   : > { %1593 = vst [vmem:[#allocation5 + $0x90] sm:$0xff] %v1430_v36  ;;  %v1434_v43 = vadd.f32 %v1433_v41, %v4294_v34  ;;  %v1435_v8 = vpop.f32.mrb[31].mxu1  ;;  %v1039_v46 = vadd.f32 %v1038_v44, %v4252_v13 }
 0x2f3   : > { %1594 = vst [vmem:[#allocation5 + $0x98] sm:$0xff] %v1432_v39  ;;  %v1436_v47 = vadd.f32 %v1435_v8, %v4299_v37  ;;  %v1145_v48 = vpack.c.bf16 %v1037_v42, %v1033_v5 }
 0x2f4   : > { %1596 = vst [vmem:[#allocation5 + $0xa8] sm:$0xff] %v1434_v43  ;;  %v1161_v50 = vpack.c.bf16 %v1039_v46, %v1035_v45 }
 0x2f5   : > { %1597 = vst [vmem:[#allocation5 + $0xb0] sm:$0xff] %v1436_v47  ;;  %1153 = vst [vmem:[#allocation4 + $0x38] sm:$0xff] %v1145_v48 }
 0x2f6   : > { %1170 = vst [vmem:[#allocation4 + $0x78] sm:$0xff] %v1161_v50  ;;  %v3130_v51 = vpop.f32.mrb[32].mxu0 }
 0x2f7   : > { %v1439_v9 = vpop.f32.mrb[32].mxu1  ;;  %v1521_v53 = vadd.f32 %v3130_v51, %v4336_v49  ;;  %v1512_v54 = vpop.f32.mrb[33].mxu0 }
 0x2f8   : > { %v1440_v52 = vadd.f32 %v1439_v9, %v4294_v34  ;;  %v1441_v13 = vpop.f32.mrb[33].mxu1  ;;  %v1513_v56 = vadd.f32 %v1512_v54, %v4336_v49  ;;  %v3131_v57 = vpop.f32.mrb[34].mxu0 }
 0x2f9   : > { %v1442_v55 = vadd.f32 %v1441_v13, %v4299_v37  ;;  %v1443_v4 = vpop.f32.mrb[34].mxu1  ;;  %1583 = vst [vmem:[#allocation5 + $0x40] sm:$0xff] %v1521_v53  ;;  %v1524_v21 = vadd.f32 %v3131_v57, %v4336_v49  ;;  %v1515_v59 = vpop.f32.mrb[35].mxu0 }
 0x2fa   : > { %1599 = vst [vmem:[#allocation5 + $0xc0] sm:$0xff] %v1440_v52  ;;  %v1444_v6 = vadd.f32 %v1443_v4, %v4294_v34  ;;  %v1445_v58 = vpop.f32.mrb[35].mxu1  ;;  %1577 = vst [vmem:[#allocation5 + $0x10] sm:$0xff] %v1513_v56  ;;  %v1516_v61 = vadd.f32 %v1515_v59, %v4336_v49 }
 0x2fb   : > { %1600 = vst [vmem:[#allocation5 + $0xc8] sm:$0xff] %v1442_v55  ;;  %v1446_v60 = vadd.f32 %v1445_v58, %v4299_v37  ;;  %1586 = vst [vmem:[#allocation5 + $0x58] sm:$0xff] %v1524_v21 }
 0x2fc   : > { %1602 = vst [vmem:[#allocation5 + $0xd8] sm:$0xff] %v1444_v6  ;;  %1580 = vst [vmem:[#allocation5 + $0x28] sm:$0xff] %v1516_v61 }
 0x2fd   : > { %1603 = vst [vmem:[#allocation5 + $0xe0] sm:$0xff] %v1446_v60 }
 0x2fe   : > { %v3134_v63 = vpop.f32.mrb[36].mxu0 }
 0x2ff   : > { %v1449_v62 = vpop.f32.mrb[36].mxu1  ;;  %v1537_v1 = vadd.f32 %v3134_v63, %v4336_v49  ;;  %v1528_v3 = vpop.f32.mrb[37].mxu0 }
 0x300   : > { %v1450_v0 = vadd.f32 %v1449_v62, %v4294_v34  ;;  %v1451_v2 = vpop.f32.mrb[37].mxu1  ;;  %v1529_v11 = vadd.f32 %v1528_v3, %v4336_v49  ;;  %v3135_v14 = vpop.f32.mrb[38].mxu0 }
 0x301   : > { %v1452_v7 = vadd.f32 %v1451_v2, %v4299_v37  ;;  %v1453_v12 = vpop.f32.mrb[38].mxu1  ;;  %1595 = vst [vmem:[#allocation5 + $0xa0] sm:$0xff] %v1537_v1  ;;  %v1540_v16 = vadd.f32 %v3135_v14, %v4336_v49  ;;  %v1531_v18 = vpop.f32.mrb[39].mxu0 }
 0x302   : > { %1605 = vst [vmem:[#allocation5 + $0xf0] sm:$0xff] %v1450_v0  ;;  %v1454_v15 = vadd.f32 %v1453_v12, %v4294_v34  ;;  %v1455_v17 = vpop.f32.mrb[39].mxu1  ;;  %1589 = vst [vmem:[#allocation5 + $0x70] sm:$0xff] %v1529_v11  ;;  %v1532_v20 = vadd.f32 %v1531_v18, %v4336_v49 }
 0x303   : > { %1606 = vst [vmem:[#allocation5 + $0xf8] sm:$0xff] %v1452_v7  ;;  %v1456_v19 = vadd.f32 %v1455_v17, %v4299_v37  ;;  %1598 = vst [vmem:[#allocation5 + $0xb8] sm:$0xff] %v1540_v16 }
 0x304   : > { %1608 = vst [vmem:[#allocation5 + $0x108] sm:$0xff] %v1454_v15  ;;  %1592 = vst [vmem:[#allocation5 + $0x88] sm:$0xff] %v1532_v20 }
 0x305   : > { %1609 = vst [vmem:[#allocation5 + $0x110] sm:$0xff] %v1456_v19 }
 0x306   : > { %v3138_v23 = vpop.f32.mrb[40].mxu0 }
 0x307   : > { %v1459_v22 = vpop.f32.mrb[40].mxu1  ;;  %v1553_v25 = vadd.f32 %v3138_v23, %v4336_v49  ;;  %v1544_v27 = vpop.f32.mrb[41].mxu0 }
 0x308   : > { %v1460_v24 = vadd.f32 %v1459_v22, %v4294_v34  ;;  %v1461_v26 = vpop.f32.mrb[41].mxu1  ;;  %v1545_v29 = vadd.f32 %v1544_v27, %v4336_v49  ;;  %v3139_v31 = vpop.f32.mrb[42].mxu0 }
 0x309   : > { %v1462_v28 = vadd.f32 %v1461_v26, %v4299_v37  ;;  %v1463_v30 = vpop.f32.mrb[42].mxu1  ;;  %1607 = vst [vmem:[#allocation5 + $0x100] sm:$0xff] %v1553_v25  ;;  %v1556_v33 = vadd.f32 %v3139_v31, %v4336_v49  ;;  %v1547_v36 = vpop.f32.mrb[43].mxu0 }
 0x30a   : > { %1611 = vst [vmem:[#allocation5 + $0x120] sm:$0xff] %v1460_v24  ;;  %v1464_v32 = vadd.f32 %v1463_v30, %v4294_v34  ;;  %v1465_v35 = vpop.f32.mrb[43].mxu1  ;;  %1601 = vst [vmem:[#allocation5 + $0xd0] sm:$0xff] %v1545_v29  ;;  %v1548_v10 = vadd.f32 %v1547_v36, %v4336_v49 }
 0x30b   : > { %1612 = vst [vmem:[#allocation5 + $0x128] sm:$0xff] %v1462_v28  ;;  %v1466_v38 = vadd.f32 %v1465_v35, %v4299_v37  ;;  %1610 = vst [vmem:[#allocation5 + $0x118] sm:$0xff] %v1556_v33 }
 0x30c   : > { %1614 = vst [vmem:[#allocation5 + $0x138] sm:$0xff] %v1464_v32  ;;  %1604 = vst [vmem:[#allocation5 + $0xe8] sm:$0xff] %v1548_v10 }
 0x30d   : > { %1615 = vst [vmem:[#allocation5 + $0x140] sm:$0xff] %v1466_v38 }
 0x30e   : > { %v3142_v40 = vpop.f32.mrb[44].mxu0 }
 0x30f   : > { %v1469_v39 = vpop.f32.mrb[44].mxu1  ;;  %v1569_v5 = vadd.f32 %v3142_v40, %v4336_v49  ;;  %v1560_v43 = vpop.f32.mrb[45].mxu0 }
 0x310   : > { %v1470_v41 = vadd.f32 %v1469_v39, %v4294_v34  ;;  %v1471_v42 = vpop.f32.mrb[45].mxu1  ;;  %v1561_v8 = vadd.f32 %v1560_v43, %v4336_v49  ;;  %v3143_v46 = vpop.f32.mrb[46].mxu0 }
 0x311   : > { %v1472_v44 = vadd.f32 %v1471_v42, %v4299_v37  ;;  %v1473_v45 = vpop.f32.mrb[46].mxu1  ;;  %1619 = vst [vmem:[#allocation5 + $0x160] sm:$0xff] %v1569_v5  ;;  %v1572_v48 = vadd.f32 %v3143_v46, %v4336_v49  ;;  %v1563_v9 = vpop.f32.mrb[47].mxu0 }
 0x312   : > { %1617 = vst [vmem:[#allocation5 + $0x150] sm:$0xff] %v1470_v41  ;;  %v1474_v47 = vadd.f32 %v1473_v45, %v4294_v34  ;;  %v1475_v50 = vpop.f32.mrb[47].mxu1  ;;  %1613 = vst [vmem:[#allocation5 + $0x130] sm:$0xff] %v1561_v8  ;;  %v1564_v52 = vadd.f32 %v1563_v9, %v4336_v49 }
 0x313   : > { %1618 = vst [vmem:[#allocation5 + $0x158] sm:$0xff] %v1472_v44  ;;  %v1476_v51 = vadd.f32 %v1475_v50, %v4299_v37  ;;  %1622 = vst [vmem:[#allocation5 + $0x178] sm:$0xff] %v1572_v48 }
 0x314   : > { %1620 = vst [vmem:[#allocation5 + $0x168] sm:$0xff] %v1474_v47  ;;  %1616 = vst [vmem:[#allocation5 + $0x148] sm:$0xff] %v1564_v52 }
 0x315   : > { %1621 = vst [vmem:[#allocation5 + $0x170] sm:$0xff] %v1476_v51 }
 0x316 PF: > { %s2965_s8 = sshll.u32 %s3873_s13, 6  ;;  %p1846_p10 = scmp.eq.s32.totalorder %s3873_s13, 2  ;;  %v1637_v31 = vld [vmem:[#allocation2 + $0x70] sm:$0xff]  ;;  %v1638_v10 = vld [vmem:[#allocation2 + $0x78] sm:$0xff] }
 0x317   : > { %s4371_s0 = scalar_lea.vmem [#allocation4], %s2965_s8  ;;  %s4376_s9 = scalar_lea.vmem [#allocation11], %s2965_s8  ;;  %v1623_v0 = vld [vmem:[#allocation2] sm:$0xff]  ;;  %v1624_v17 = vld [vmem:[#allocation2 + $0x8] sm:$0xff] }
 0x318   : > { %v1661_v34 = vld [vmem:[%s4371_s0] sm:$0xff]  ;;  %v1662_v53 = vld [vmem:[%s4371_s0 + $0x8] sm:$0xff]  ;;  %v1663_v37 = vld [vmem:[%s4371_s0 + $0x10] sm:$0xff]  ;;  %s4672_s1 = sld [smem:[#allocation26_spill]] (%p1846_p10) }
 0x319   : > { %3144 = vmatprep.subr.bf16.mxu0 %v1661_v34  ;;  %3224 = vmatprep.subr.bf16.mxu1 %v1661_v34  ;;  %v3437_v49 = vld [vmem:[%s4376_s9] sm:$0xff]   ;;  %v1664_v54 = vld [vmem:[%s4371_s0 + $0x18] sm:$0xff]  ;;  %v1666_v56 = vld [vmem:[%s4371_s0 + $0x28] sm:$0xff] }
 0x31a   : > { %3145 = vmatpush3.bf16.msra.mxu0 %v1661_v34  ;;  %3232 = vmatpush3.bf16.msra.mxu1 %v1661_v34  ;;  %v3438_v13 = vld [vmem:[%s4376_s9 + $0x20] sm:$0xff]   ;;  %v1667_v4 = vld [vmem:[%s4371_s0 + $0x30] sm:$0xff]  ;;  %v1668_v57 = vld [vmem:[%s4371_s0 + $0x38] sm:$0xff] }
 0x31b   : > { %3146 = vmatprep.subr.bf16.mxu0 %v1662_v53  ;;  %3225 = vmatprep.subr.bf16.mxu1 %v1662_v53  ;;  %v1665_v55 = vld [vmem:[%s4371_s0 + $0x20] sm:$0xff]  ;;  %v3439_v6 = vld [vmem:[%s4376_s9 + $0x8] sm:$0xff]   ;;  %v3441_v58 = vld [vmem:[%s4376_s9 + $0x10] sm:$0xff]  }
 0x31c   : > { %3160 = vmatprep.mubr.bf16.mxu0 %v3437_v49  ;;  %3168 = vmatprep.mubr.bf16.mxu1 %v3438_v13  ;;  %v3440_v21 = vld [vmem:[%s4376_s9 + $0x28] sm:$0xff]   ;;  %v3442_v59 = vld [vmem:[%s4376_s9 + $0x30] sm:$0xff]   ;;  %v3443_v60 = vld [vmem:[%s4376_s9 + $0x18] sm:$0xff]  }
 0x31d   : > { %v3444_v61 = vld [vmem:[%s4376_s9 + $0x38] sm:$0xff]   ;;  %v1625_v62 = vld [vmem:[#allocation2 + $0x10] sm:$0xff]  ;;  %v1631_v1 = vld [vmem:[#allocation2 + $0x40] sm:$0xff] }
 0x31e   : > { %3147 = vmatpush3.bf16.msra.mxu0 %v1662_v53  ;;  %3233 = vmatpush3.bf16.msra.mxu1 %v1662_v53  ;;  %v1633_v63 = vld [vmem:[#allocation2 + $0x50] sm:$0xff]  ;;  %v1626_v7 = vld [vmem:[#allocation2 + $0x18] sm:$0xff]  ;;  %v1632_v18 = vld [vmem:[#allocation2 + $0x48] sm:$0xff] }
 0x31f   : > { %3148 = vmatprep.subr.bf16.mxu0 %v1663_v37  ;;  %3226 = vmatprep.subr.bf16.mxu1 %v1663_v37  ;;  %v1634_v11 = vld [vmem:[#allocation2 + $0x58] sm:$0xff]  ;;  %v1629_v30 = vld [vmem:[#allocation2 + $0x30] sm:$0xff]  ;;  %v1627_v32 = vld [vmem:[#allocation2 + $0x20] sm:$0xff] }
 0x320   : > { %v1635_v33 = vld [vmem:[#allocation2 + $0x60] sm:$0xff]  ;;  %v1630_v38 = vld [vmem:[#allocation2 + $0x38] sm:$0xff]  ;;  %v1628_v42 = vld [vmem:[#allocation2 + $0x28] sm:$0xff] }
 0x321   : > { %v1636_v43 = vld [vmem:[#allocation2 + $0x68] sm:$0xff]  ;;  %v3445_v34 = vld [vmem:[#allocation14 + $0x4] ss:$12 sps:$4 sm:$0xff] (%p1846_p10)  }
 0x322   : > { %3149 = vmatpush3.bf16.msra.mxu0 %v1663_v37  ;;  %3234 = vmatpush3.bf16.msra.mxu1 %v1663_v37  ;;  %v3447_v53 = vld [vmem:[#allocation14] ss:$12 sps:$4 sm:$0xff] (%p1846_p10)   ;;  %v3903_v37 = vmov (%p1846_p10), 0   ;;  %v3448_v49 = vld [vmem:[#allocation14 + $0x1c] ss:$12 sps:$4 sm:$0xff] (%p1846_p10)  }
 0x323   : > { %3150 = vmatprep.subr.bf16.mxu0 %v1664_v54  ;;  %3227 = vmatprep.subr.bf16.mxu1 %v1664_v54  ;;  %v3450_v13 = vld [vmem:[#allocation14 + $0x18] ss:$12 sps:$4 sm:$0xff] (%p1846_p10)  }
 0x326   : > { %3151 = vmatpush3.bf16.msra.mxu0 %v1664_v54  ;;  %3235 = vmatpush3.bf16.msra.mxu1 %v1664_v54  ;;  %v3451_v54 = vld [vmem:[#allocation14 + $0x34] ss:$12 sps:$4 sm:$0xff] (%p1846_p10)  }
 0x327   : > { %3152 = vmatprep.subr.bf16.mxu0 %v1665_v55  ;;  %3228 = vmatprep.subr.bf16.mxu1 %v1665_v55 }
 0x32a   : > { %3153 = vmatpush3.bf16.msra.mxu0 %v1665_v55  ;;  %3236 = vmatpush3.bf16.msra.mxu1 %v1665_v55  ;;  %v3453_v55 = vld [vmem:[#allocation14 + $0x30] ss:$12 sps:$4 sm:$0xff] (%p1846_p10)  }
 0x32b   : > { %3154 = vmatprep.subr.bf16.mxu0 %v1666_v56  ;;  %3229 = vmatprep.subr.bf16.mxu1 %v1666_v56 }
 0x32e   : > { %3155 = vmatpush3.bf16.msra.mxu0 %v1666_v56  ;;  %3237 = vmatpush3.bf16.msra.mxu1 %v1666_v56  ;;  %v3454_v56 = vld [vmem:[#allocation14 + $0x4c] ss:$12 sps:$4 sm:$0xff] (%p1846_p10)  }
 0x32f   : > { %3156 = vmatprep.subr.bf16.mxu0 %v1667_v4  ;;  %3230 = vmatprep.subr.bf16.mxu1 %v1667_v4 }
 0x332   : > { %3157 = vmatpush3.bf16.msra.mxu0 %v1667_v4  ;;  %3238 = vmatpush3.bf16.msra.mxu1 %v1667_v4  ;;  %v3456_v4 = vld [vmem:[#allocation14 + $0x48] ss:$12 sps:$4 sm:$0xff] (%p1846_p10)  }
 0x333   : > { %3158 = vmatprep.subr.bf16.mxu0 %v1668_v57  ;;  %3231 = vmatprep.subr.bf16.mxu1 %v1668_v57 }
 0x336   : > { %3159 = vmatpush3.bf16.msra.mxu0 %v1668_v57  ;;  %3239 = vmatpush3.bf16.msra.mxu1 %v1668_v57  ;;  %v3457_v57 = vld [vmem:[#allocation14 + $0x64] ss:$12 sps:$4 sm:$0xff] (%p1846_p10)  }
 0x337   : > { %2068 = vmatprep.subr.bf16.mxu0 (%p1846_p10), %v3445_v34 }
 0x339   : > { %3161 = vmatmul.mubr.bf16.vlgmr.msra.gmra.mrb[0].mxu0 %v3439_v6  ;;  %3169 = vmatmul.mubr.bf16.vlgmr.msra.gmra.mrb[0].mxu1 %v3440_v21  ;;  %v3469_v6 = vld [vmem:[#allocation14 + $0x8] ss:$12 sps:$4 sm:$0xff] (%p1846_p10)  }
 0x33a   : > { %3164 = vmatprep.mubr.bf16.mxu0 %v3441_v58  ;;  %3172 = vmatprep.mubr.bf16.mxu1 %v3442_v59  ;;  %v3470_v59 = vld [vmem:[#allocation14 + $0x20] ss:$12 sps:$4 sm:$0xff] (%p1846_p10)  }
 0x33b   : > { %2069 = vmatpush1.bf16.msra.mxu0 (%p1846_p10), %v3447_v53  ;;  %3176 = vmatprep.subr.bf16.mxu1 (%p1846_p10), %v3469_v6 }
 0x33c   : > { %2070 = vmatprep.subr.bf16.mxu0 (%p1846_p10), %v3448_v49  ;;  %3177 = vmatpush3.bf16.msra.mxu1 (%p1846_p10), %v3469_v6  ;;  %v2282_v49 = vld [vmem:[#allocation5 + $0x20] sm:$0xff] (%p1846_p10) }
 0x33d   : > { %3178 = vmatprep.subr.bf16.mxu1 (%p1846_p10), %v3470_v59 }
 0x33f   : > { %2071 = vmatpush1.bf16.msra.mxu0 (%p1846_p10), %v3450_v13 }
 0x340   : > { %2072 = vmatprep.subr.bf16.mxu0 (%p1846_p10), %v3451_v54  ;;  %3179 = vmatpush3.bf16.msra.mxu1 (%p1846_p10), %v3470_v59  ;;  %v2284_v59 = vld [vmem:[#allocation5 + $0x30] sm:$0xff] (%p1846_p10) }
 0x341   : > { %3165 = vmatmul.mubr.bf16.gmra.mrb[4].mxu0 %v3443_v60  ;;  %3173 = vmatmul.mubr.bf16.gmra.mrb[4].mxu1 %v3444_v61  ;;  %v3459_v60 = vld [vmem:[#allocation14 + $0x60] ss:$12 sps:$4 sm:$0xff] (%p1846_p10)  }
 0x342   : > { %2100 = vmatprep.mubr.bf16.mxu0 (%p1846_p10), %v3903_v37 }
 0x343   : > { %2073 = vmatpush1.bf16.msra.mxu0 (%p1846_p10), %v3453_v55 }
 0x344   : > { %2074 = vmatprep.subr.bf16.mxu0 (%p1846_p10), %v3454_v56 }
 0x347   : > { %2075 = vmatpush1.bf16.msra.mxu0 (%p1846_p10), %v3456_v4 }
 0x348   : > { %2076 = vmatprep.subr.bf16.mxu0 (%p1846_p10), %v3457_v57 }
 0x34b   : > { %2077 = vmatpush1.bf16.msra.mxu0 (%p1846_p10), %v3459_v60 }
 0x40c   : > { %v3162_v2 = vpop.f32.mrb[0].mxu0  ;;  %v3170_v3 = vpop.f32.mrb[0].mxu1 }
 0x40d   : > { %v1816_v12 = vadd.f32 %v3162_v2, %v1625_v62  ;;  %v1824_v14 = vadd.f32 %v3170_v3, %v1633_v63  ;;  %v1751_v15 = vpop.f32.mrb[1].mxu0  ;;  %v1783_v16 = vpop.f32.mrb[1].mxu1  ;;  %v3471_v62 = vld [vmem:[#allocation14 + $0x38] ss:$12 sps:$4 sm:$0xff] (%p1846_p10)   ;;  %v3460_v63 = vld [vmem:[#allocation14 + $0x7c] ss:$12 sps:$4 sm:$0xff] (%p1846_p10)  }
 0x40e   : > { %v1814_v19 = vadd.f32 %v1751_v15, %v1623_v0  ;;  %v1822_v20 = vadd.f32 %v1783_v16, %v1631_v1  ;;  %v3163_v22 = vpop.f32.mrb[2].mxu0  ;;  %v3171_v23 = vpop.f32.mrb[2].mxu1  ;;  %v3462_v0 = vld [vmem:[#allocation14 + $0x78] ss:$12 sps:$4 sm:$0xff] (%p1846_p10)   ;;  %3180 = vmatprep.subr.bf16.mxu1 (%p1846_p10), %v3471_v62  ;;  %v3472_v1 = vld [vmem:[#allocation14 + $0x50] ss:$12 sps:$4 sm:$0xff] (%p1846_p10)   ;;  %2078 = vmatprep.subr.bf16.mxu0 (%p1846_p10), %v3460_v63 }
 0x40f   : > { %1832 = vst [vmem:[#allocation2 + $0x10] sm:$0xff] %v1816_v12  ;;  %1840 = vst [vmem:[#allocation2 + $0x50] sm:$0xff] %v1824_v14  ;;  %v1817_v24 = vadd.f32 %v3163_v22, %v1626_v7  ;;  %v1825_v25 = vadd.f32 %v3171_v23, %v1634_v11  ;;  %v1754_v26 = vpop.f32.mrb[3].mxu0  ;;  %v1786_v27 = vpop.f32.mrb[3].mxu1  ;;  %v3463_v2 = vld [vmem:[#allocation14 + $0x94] ss:$12 sps:$4 sm:$0xff] (%p1846_p10)   ;;  %3181 = vmatpush3.bf16.msra.mxu1 (%p1846_p10), %v3471_v62  ;;  %2079 = vmatpush1.bf16.msra.mxu0 (%p1846_p10), %v3462_v0 }
 0x410   : > { %1830 = vst [vmem:[#allocation2] sm:$0xff] %v1814_v19  ;;  %1838 = vst [vmem:[#allocation2 + $0x40] sm:$0xff] %v1822_v20  ;;  %v1815_v28 = vadd.f32 %v1754_v26, %v1624_v17  ;;  %v1823_v29 = vadd.f32 %v1786_v27, %v1632_v18  ;;  %v3465_v3 = vld [vmem:[#allocation14 + $0x90] ss:$12 sps:$4 sm:$0xff] (%p1846_p10)   ;;  %3182 = vmatprep.subr.bf16.mxu1 (%p1846_p10), %v3472_v1  ;;  %v3473_v7 = vld [vmem:[#allocation14 + $0x68] ss:$12 sps:$4 sm:$0xff] (%p1846_p10)   ;;  %2080 = vmatprep.subr.bf16.mxu0 (%p1846_p10), %v3463_v2 }
 0x411   : > { %1833 = vst [vmem:[#allocation2 + $0x18] sm:$0xff] %v1817_v24  ;;  %1841 = vst [vmem:[#allocation2 + $0x58] sm:$0xff] %v1825_v25  ;;  %v3466_v11 = vld [vmem:[#allocation14 + $0xac] ss:$12 sps:$4 sm:$0xff] (%p1846_p10)   ;;  %v3468_v12 = vld [vmem:[#allocation14 + $0xa8] ss:$12 sps:$4 sm:$0xff] (%p1846_p10)  }
 0x412   : > { %1831 = vst [vmem:[#allocation2 + $0x8] sm:$0xff] %v1815_v28  ;;  %1839 = vst [vmem:[#allocation2 + $0x48] sm:$0xff] %v1823_v29  ;;  %v3474_v14 = vld [vmem:[#allocation14 + $0x80] ss:$12 sps:$4 sm:$0xff] (%p1846_p10)   ;;  %v3475_v15 = vld [vmem:[#allocation14 + $0x98] ss:$12 sps:$4 sm:$0xff] (%p1846_p10)  }
 0x413   : > { %3183 = vmatpush3.bf16.msra.mxu1 (%p1846_p10), %v3472_v1  ;;  %2081 = vmatpush1.bf16.msra.mxu0 (%p1846_p10), %v3465_v3  ;;  %v3476_v18 = vld [vmem:[#allocation14 + $0xb0] ss:$12 sps:$4 sm:$0xff] (%p1846_p10)   ;;  %v2287_v1 = vld [vmem:[#allocation5 + $0x48] sm:$0xff] (%p1846_p10) }
 0x414   : > { %v3166_v35 = vpop.f32.mrb[4].mxu0  ;;  %v3174_v36 = vpop.f32.mrb[4].mxu1  ;;  %1850 = sbr.rel (!%p1846_p10) target bundleno = 1384 (0x568), region = 96  ;;  %3184 = vmatprep.subr.bf16.mxu1 (%p1846_p10), %v3473_v7  ;;  %2082 = vmatprep.subr.bf16.mxu0 (%p1846_p10), %v3466_v11  ;;  %v2285_v62 = vld [vmem:[#allocation5 + $0x38] sm:$0xff] (%p1846_p10)  ;;  %v2288_v11 = vld [vmem:[#allocation5 + $0x50] sm:$0xff] (%p1846_p10) }
 0x415   : > { %v1820_v39 = vadd.f32 %v3166_v35, %v1629_v30  ;;  %v1828_v40 = vadd.f32 %v3174_v36, %v1637_v31  ;;  %v1767_v41 = vpop.f32.mrb[5].mxu0  ;;  %v1799_v5 = vpop.f32.mrb[5].mxu1 }
 0x416   : > { %v1818_v44 = vadd.f32 %v1767_v41, %v1627_v32  ;;  %v1826_v8 = vadd.f32 %v1799_v5, %v1635_v33  ;;  %v3167_v45 = vpop.f32.mrb[6].mxu0  ;;  %v3175_v46 = vpop.f32.mrb[6].mxu1  ;;  %v1869_v16 = vld [vmem:[#allocation2 + $0x10] sm:$0xff] (%p1846_p10) }
 0x417   : > { %1836 = vst [vmem:[#allocation2 + $0x30] sm:$0xff] %v1820_v39  ;;  %1844 = vst [vmem:[#allocation2 + $0x70] sm:$0xff] %v1828_v40  ;;  %v1821_v47 = vadd.f32 %v3167_v45, %v1630_v38  ;;  %v1829_v48 = vadd.f32 %v3175_v46, %v1638_v10  ;;  %v1770_v50 = vpop.f32.mrb[7].mxu0  ;;  %v1802_v9 = vpop.f32.mrb[7].mxu1  ;;  %v1867_v21 = vld [vmem:[#allocation2] sm:$0xff] (%p1846_p10)  ;;  %3185 = vmatpush3.bf16.msra.mxu1 (%p1846_p10), %v3473_v7  ;;  %2083 = vmatpush1.bf16.msra.mxu0 (%p1846_p10), %v3468_v12  ;;  %v1877_v30 = vld [vmem:[#allocation2 + $0x50] sm:$0xff] (%p1846_p10)  ;;  %v1925_v40 = vlaneseq (%p1846_p10) }
 0x418   : > { %1834 = vst [vmem:[#allocation2 + $0x20] sm:$0xff] %v1818_v44  ;;  %1842 = vst [vmem:[#allocation2 + $0x60] sm:$0xff] %v1826_v8  ;;  %v1819_v51 = vadd.f32 %v1770_v50, %v1628_v42  ;;  %v1827_v52 = vadd.f32 %v1802_v9, %v1636_v43  ;;  %3186 = vmatprep.subr.bf16.mxu1 (%p1846_p10), %v3474_v14  ;;  %v1870_v17 = vld [vmem:[#allocation2 + $0x18] sm:$0xff] (%p1846_p10)  ;;  %v1875_v26 = vld [vmem:[#allocation2 + $0x40] sm:$0xff] (%p1846_p10) }
 0x419   : > { %1837 = vst [vmem:[#allocation2 + $0x38] sm:$0xff] %v1821_v47  ;;  %1845 = vst [vmem:[#allocation2 + $0x78] sm:$0xff] %v1829_v48  ;;  %v1868_v58 = vld [vmem:[#allocation2 + $0x8] sm:$0xff] (%p1846_p10)  ;;  %v1884_v19 = vpack.c.bf16 (%p1846_p10), %v1870_v17, %v1869_v16  ;;  %v1878_v31 = vld [vmem:[#allocation2 + $0x58] sm:$0xff] (%p1846_p10)  ;;  %v4402_v41 = vshrl.u32 (%p1846_p10), %v1925_v40, 7 }
 0x41a   : > { %1835 = vst [vmem:[#allocation2 + $0x28] sm:$0xff] %v1819_v51  ;;  %1843 = vst [vmem:[#allocation2 + $0x68] sm:$0xff] %v1827_v52  ;;  %v1883_v61 = vpack.c.bf16 (%p1846_p10), %v1868_v58, %v1867_v21  ;;  %v1876_v27 = vld [vmem:[#allocation2 + $0x48] sm:$0xff] (%p1846_p10)  ;;  %v1888_v35 = vpack.c.bf16 (%p1846_p10), %v1878_v31, %v1877_v30  ;;  %v4408_v42 = vld [vmem:[%s4672_s1] sm:$0x7] (%p1846_p10) }
 0x41b   : > { %3187 = vmatpush3.bf16.msra.mxu1 %v3474_v14  ;;  %v1887_v29 = vpack.c.bf16 %v1876_v27, %v1875_v26  ;;  %v1927_v5 = vsub.s32 0, %v4402_v41  ;;  %v1931_v43 = vsub.s32 1, %v4402_v41  ;;  %v2278_v46 = vld [vmem:[#allocation5] sm:$0xff]  ;;  %v2279_v50 = vld [vmem:[#allocation5 + $0x8] sm:$0xff]  ;;  %v2281_v52 = vld [vmem:[#allocation5 + $0x18] sm:$0xff] }
 0x41c   : > { %3192 = vmatprep.mubr.bf16.mxu1 %v1883_v61  ;;  %2101 = vmatmul.mubr.bf16.vlgmr.msra.gmra.mrb[0].mxu0 %v1883_v61  ;;  %v2290_v27 = vld [vmem:[#allocation5 + $0x60] sm:$0xff]  ;;  %v2291_v31 = vld [vmem:[#allocation5 + $0x68] sm:$0xff] }
 0x41d   : > { %2110 = vmatprep.mubr.bf16.mxu0 %v3903_v37  ;;  %3188 = vmatprep.subr.bf16.mxu1 %v3475_v15  ;;  %v4412_v44 = vrot.slane %v4408_v42, %v1927_v5  ;;  %v4415_v8 = vrot.slane %v4408_v42, %v1931_v43 }
 0x41e   : > { %v1873_v24 = vld [vmem:[#allocation2 + $0x30] sm:$0xff] }
 0x41f   : > { %3189 = vmatpush3.bf16.msra.mxu1 %v3475_v15  ;;  %v1871_v20 = vld [vmem:[#allocation2 + $0x20] sm:$0xff]  ;;  %v1881_v38 = vld [vmem:[#allocation2 + $0x70] sm:$0xff] }
 0x420   : > { %3190 = vmatprep.subr.bf16.mxu1 %v3476_v18  ;;  %v1874_v25 = vld [vmem:[#allocation2 + $0x38] sm:$0xff]  ;;  %v1879_v32 = vld [vmem:[#allocation2 + $0x60] sm:$0xff] }
 0x421   : > { %v1872_v22 = vld [vmem:[#allocation2 + $0x28] sm:$0xff]  ;;  %v1886_v28 = vpack.c.bf16 %v1874_v25, %v1873_v24  ;;  %v1882_v10 = vld [vmem:[#allocation2 + $0x78] sm:$0xff] }
 0x422   : > { %v1885_v23 = vpack.c.bf16 %v1872_v22, %v1871_v20  ;;  %v1880_v33 = vld [vmem:[#allocation2 + $0x68] sm:$0xff]  ;;  %v1890_v39 = vpack.c.bf16 %v1882_v10, %v1881_v38  ;;  %v2293_v38 = vld [vmem:[#allocation5 + $0x78] sm:$0xff]  ;;  %v1935_v10 = vsub.s32 2, %v4402_v41 }
 0x423   : > { %3191 = vmatpush3.bf16.msra.mxu1 %v3476_v18  ;;  %v1889_v36 = vpack.c.bf16 %v1880_v33, %v1879_v32 }
 0x424   : > { %2111 = vmatmul.mubr.bf16.gmra.mrb[4].mxu0 %v1884_v19 }
 0x425   : > { %2120 = vmatprep.mubr.bf16.mxu0 %v3903_v37 }
 0x426   : > { %3193 = vmatmul.mubr.bf16.vlgmr.msra.gmra.mrb[0].mxu1 %v1884_v19 }
 0x427   : > { %3196 = vmatprep.mubr.bf16.mxu1 %v1885_v23 }
 0x42c   : > { %2121 = vmatmul.mubr.bf16.gmra.mrb[8].mxu0 %v1885_v23 }
 0x42d   : > { %2130 = vmatprep.mubr.bf16.mxu0 %v3903_v37 }
 0x42e   : > { %3197 = vmatmul.mubr.bf16.gmra.mrb[4].mxu1 %v1886_v28 }
 0x42f   : > { %3200 = vmatprep.mubr.bf16.mxu1 %v1887_v29 }
 0x434   : > { %2131 = vmatmul.mubr.bf16.gmra.mrb[12].mxu0 %v1886_v28 }
 0x435   : > { %2140 = vmatprep.mubr.bf16.mxu0 %v3903_v37 }
 0x436   : > { %3201 = vmatmul.mubr.bf16.gmra.mrb[8].mxu1 %v1888_v35 }
 0x437   : > { %3204 = vmatprep.mubr.bf16.mxu1 %v1889_v36 }
 0x43c   : > { %2141 = vmatmul.mubr.bf16.gmra.mrb[16].mxu0 %v1887_v29 }
 0x43d   : > { %2150 = vmatprep.mubr.bf16.mxu0 %v3903_v37 }
 0x43e   : > { %3205 = vmatmul.mubr.bf16.gmra.mrb[12].mxu1 %v1890_v39 }
 0x444   : > { %2151 = vmatmul.mubr.bf16.gmra.mrb[20].mxu0 %v1888_v35 }
 0x445   : > { %2160 = vmatprep.mubr.bf16.mxu0 %v3903_v37 }
 0x44c   : > { %2161 = vmatmul.mubr.bf16.gmra.mrb[24].mxu0 %v1889_v36 }
 0x44d   : > { %2170 = vmatprep.mubr.bf16.mxu0 %v3903_v37 }
 0x454   : > { %2171 = vmatmul.mubr.bf16.gmra.mrb[28].mxu0 %v1890_v39 }
 0x4ef   : > { %v2102_v45 = vpop.f32.mrb[0].mxu0 }
 0x4f0   : > { %v2103_v47 = vadd.f32 %v2102_v45, %v4412_v44  ;;  %v2104_v48 = vpop.f32.mrb[1].mxu0 }
 0x4f1   : > { %v2105_v9 = vadd.f32 %v2104_v48, %v4415_v8  ;;  %v2106_v51 = vpop.f32.mrb[2].mxu0 }
 0x4f2   : > { %v2326_v34 = vadd.f32 %v2278_v46, %v2103_v47  ;;  %v2107_v53 = vadd.f32 %v2106_v51, %v4412_v44  ;;  %v2108_v37 = vpop.f32.mrb[3].mxu0  ;;  %v2294_v46 = vld [vmem:[#allocation5 + $0x80] sm:$0xff] }
 0x4f3   : > { %v2438_v13 = vadd.f32 %v2279_v50, %v2105_v9  ;;  %v2109_v54 = vadd.f32 %v2108_v37, %v4415_v8 }
 0x4f4   : > { %v2928_v55 = vmul.f32 -1.442695, %v2326_v34  ;;  %v2327_v56 = vadd.f32 %v2281_v52, %v2107_v53 }
 0x4f5   : > { %v2944_v4 = vmul.f32 -1.442695, %v2438_v13  ;;  %v2439_v57 = vadd.f32 %v2282_v49, %v2109_v54  ;;  %v4445_v54 = vrot.slane %v4408_v42, %v1935_v10 }
 0x4f6   : > { %3477 = vpow2.f32 %v2928_v55  ;;  %v2929_v6 = vmul.f32 -1.442695, %v2327_v56 }
 0x4f7   : > { %3479 = vpow2.f32 %v2944_v4  ;;  %v2945_v21 = vmul.f32 -1.442695, %v2439_v57  ;;  %v2112_v58 = vpop.f32.mrb[4].mxu0 }
 0x4f8   : > { %3481 = vpow2.f32 %v2929_v6  ;;  %v2113_v60 = vadd.f32 %v2112_v58, %v4412_v44  ;;  %v2114_v61 = vpop.f32.mrb[5].mxu0  ;;  %v2296_v6 = vld [vmem:[#allocation5 + $0x90] sm:$0xff] }
 0x4f9   : > { %3483 = vpow2.f32 %v2945_v21  ;;  %v2115_v63 = vadd.f32 %v2114_v61, %v4415_v8  ;;  %v2116_v0 = vpop.f32.mrb[6].mxu0  ;;  %v4424_v12 = vpop.f32.mrb[0].mxu1 }
 0x4fa   : > { %v2328_v2 = vadd.f32 %v2284_v59, %v2113_v60  ;;  %v2117_v3 = vadd.f32 %v2116_v0, %v4412_v44  ;;  %v2118_v7 = vpop.f32.mrb[7].mxu0  ;;  %v4427_v16 = vpop.f32.mrb[1].mxu1  ;;  %v2297_v60 = vld [vmem:[#allocation5 + $0x98] sm:$0xff]  ;;  %v2299_v0 = vld [vmem:[#allocation5 + $0xa8] sm:$0xff] }
 0x4fb   : > { %v2440_v14 = vadd.f32 %v2285_v62, %v2115_v63  ;;  %v2119_v15 = vadd.f32 %v2118_v7, %v4415_v8  ;;  %v4429_v19 = vpop.f32.mrb[2].mxu1 }
 0x4fc   : > { %v2930_v17 = vmul.f32 -1.442695, %v2328_v2  ;;  %v2329_v18 = vadd.f32 %v2287_v1, %v2117_v3  ;;  %v4431_v23 = vpop.f32.mrb[3].mxu1  ;;  %v2216_v1 = vadd.f32 %v4427_v16, %v4445_v54 }
 0x4fd   : > { %v2946_v20 = vmul.f32 -1.442695, %v2440_v14  ;;  %v2441_v22 = vadd.f32 %v2288_v11, %v2119_v15  ;;  %v2300_v15 = vld [vmem:[#allocation5 + $0xb0] sm:$0xff] }
 0x4fe   : > { %3485 = vpow2.f32 %v2930_v17  ;;  %v2931_v24 = vmul.f32 -1.442695, %v2329_v18 }
 0x4ff   : > { %3487 = vpow2.f32 %v2946_v20  ;;  %v2947_v25 = vmul.f32 -1.442695, %v2441_v22  ;;  %v2122_v26 = vpop.f32.mrb[8].mxu0 }
 0x500   : > { %v3478_v28 = vpop.eup %3477  ;;  %3489 = vpow2.f32 %v2931_v24  ;;  %v2123_v29 = vadd.f32 %v2122_v26, %v4412_v44  ;;  %v2124_v30 = vpop.f32.mrb[9].mxu0 }
 0x501   : > { %v3480_v32 = vpop.eup %3479  ;;  %v2390_v33 = vadd.f32 1.0, %v3478_v28  ;;  %3491 = vpow2.f32 %v2947_v25  ;;  %v2125_v35 = vadd.f32 %v2124_v30, %v4415_v8  ;;  %v2126_v36 = vpop.f32.mrb[10].mxu0  ;;  %v2280_v25 = vld [vmem:[#allocation5 + $0x10] sm:$0xff] }
 0x502   : > { %v3482_v39 = vpop.eup %3481  ;;  %v2502_v40 = vadd.f32 1.0, %v3480_v32  ;;  %v2330_v5 = vadd.f32 %v2290_v27, %v2123_v29  ;;  %v2127_v43 = vadd.f32 %v2126_v36, %v4412_v44  ;;  %v2128_v45 = vpop.f32.mrb[11].mxu0 }
 0x503   : > { %v4437_v47 = vpop.f32.mrb[4].mxu1  ;;  %v3484_v48 = vpop.eup %3483  ;;  %3493 = vrcp.f32 %v2390_v33  ;;  %v2391_v50 = vadd.f32 1.0, %v3482_v39  ;;  %v2442_v9 = vadd.f32 %v2291_v31, %v2125_v35  ;;  %v2129_v51 = vadd.f32 %v2128_v45, %v4415_v8  ;;  %v2283_v33 = vld [vmem:[#allocation5 + $0x28] sm:$0xff]  ;;  %v2302_v45 = vld [vmem:[#allocation5 + $0xc0] sm:$0xff] }
 0x504   : > { %v4440_v52 = vpop.f32.mrb[5].mxu1  ;;  %3495 = vrcp.f32 %v2502_v40  ;;  %v2503_v34 = vadd.f32 1.0, %v3484_v48  ;;  %v2932_v41 = vmul.f32 -1.442695, %v2330_v5  ;;  %v2331_v53 = vadd.f32 %v2293_v38, %v2127_v43 }
 0x505   : > { %v4442_v37 = vpop.f32.mrb[6].mxu1  ;;  %3497 = vrcp.f32 %v2391_v50  ;;  %v2948_v49 = vmul.f32 -1.442695, %v2442_v9  ;;  %v2443_v13 = vadd.f32 %v2294_v46, %v2129_v51  ;;  %v2219_v39 = vadd.f32 %v4431_v23, %v4445_v54 }
 0x506   : > { %v4447_v55 = vpop.f32.mrb[7].mxu1  ;;  %3499 = vrcp.f32 %v2503_v34  ;;  %v2933_v56 = vmul.f32 -1.442695, %v2331_v53 }
 0x507   : > { %3501 = vpow2.f32 %v2932_v41  ;;  %v2949_v4 = vmul.f32 -1.442695, %v2443_v13  ;;  %v2132_v57 = vpop.f32.mrb[12].mxu0 }
 0x508   : > { %v3486_v21 = vpop.eup %3485  ;;  %3503 = vpow2.f32 %v2948_v49  ;;  %v2133_v58 = vadd.f32 %v2132_v57, %v4412_v44  ;;  %v2134_v59 = vpop.f32.mrb[13].mxu0 }
 0x509   : > { %v3488_v61 = vpop.eup %3487  ;;  %v2392_v62 = vadd.f32 1.0, %v3486_v21  ;;  %3505 = vpow2.f32 %v2933_v56  ;;  %v2135_v42 = vadd.f32 %v2134_v59, %v4415_v8  ;;  %v2136_v63 = vpop.f32.mrb[14].mxu0  ;;  %v2286_v59 = vld [vmem:[#allocation5 + $0x40] sm:$0xff] }
 0x50a   : > { %v3490_v2 = vpop.eup %3489  ;;  %v2504_v3 = vadd.f32 1.0, %v3488_v61  ;;  %3507 = vpow2.f32 %v2949_v4  ;;  %v2332_v7 = vadd.f32 %v2296_v6, %v2133_v58  ;;  %v2137_v11 = vadd.f32 %v2136_v63, %v4412_v44  ;;  %v2138_v14 = vpop.f32.mrb[15].mxu0  ;;  %v2303_v4 = vld [vmem:[#allocation5 + $0xc8] sm:$0xff] }
 0x50b   : > { %v4454_v17 = vpop.f32.mrb[8].mxu1  ;;  %v3492_v18 = vpop.eup %3491  ;;  %3509 = vrcp.f32 %v2392_v62  ;;  %v2393_v20 = vadd.f32 1.0, %v3490_v2  ;;  %v2444_v22 = vadd.f32 %v2297_v60, %v2135_v42  ;;  %v2139_v24 = vadd.f32 %v2138_v14, %v4415_v8 }
 0x50c   : > { %v4457_v26 = vpop.f32.mrb[9].mxu1  ;;  %3511 = vrcp.f32 %v2504_v3  ;;  %v2505_v16 = vadd.f32 1.0, %v3492_v18  ;;  %v2934_v27 = vmul.f32 -1.442695, %v2332_v7  ;;  %v2333_v28 = vadd.f32 %v2299_v0, %v2137_v11  ;;  %v2289_v3 = vld [vmem:[#allocation5 + $0x58] sm:$0xff] }
 0x50d   : > { %v4459_v29 = vpop.f32.mrb[10].mxu1  ;;  %v3494_v30 = vpop.eup %3493  ;;  %3513 = vrcp.f32 %v2393_v20  ;;  %v2950_v31 = vmul.f32 -1.442695, %v2444_v22  ;;  %v2445_v32 = vadd.f32 %v2300_v15, %v2139_v24  ;;  %v2224_v42 = vadd.f32 %v4424_v12, %v4445_v54  ;;  %v2305_v12 = vld [vmem:[#allocation5 + $0xd8] sm:$0xff] }
 0x50e   : > { %v4461_v35 = vpop.f32.mrb[11].mxu1  ;;  %v4463_v36 = vpop.eup %3495  ;;  %3515 = vrcp.f32 %v2505_v16  ;;  %v2935_v38 = vmul.f32 -1.442695, %v2333_v28  ;;  %v2550_v10 = vmul.f32 %v3494_v30, %v2280_v25  ;;  %v2227_v20 = vadd.f32 %v4429_v19, %v4445_v54 }
 0x50f   : > { %v3498_v40 = vpop.eup %3497  ;;  %3517 = vpow2.f32 %v2934_v27  ;;  %v2951_v5 = vmul.f32 -1.442695, %v2445_v32  ;;  %v2142_v43 = vpop.f32.mrb[16].mxu0  ;;  %v4488_v25 = vadd.f32 %v4437_v47, %v4445_v54  ;;  %v4492_v16 = vadd.f32 %v4440_v52, %v4445_v54  ;;  %v2308_v32 = vld [vmem:[#allocation5 + $0xf0] sm:$0xff] }
 0x510   : > { %v4467_v46 = vpop.eup %3499  ;;  %3519 = vpow2.f32 %v2950_v31  ;;  %v2566_v48 = vadd.f32 %v2550_v10, %v2216_v1  ;;  %v2143_v50 = vadd.f32 %v2142_v43, %v4412_v44  ;;  %v2551_v9 = vmul.f32 %v3498_v40, %v2283_v33  ;;  %v2144_v51 = vpop.f32.mrb[17].mxu0  ;;  %v1852_v43 = vld [vmem:[#allocation17 + $0x8] sm:$0xff] }
 0x511   : > { %v3502_v34 = vpop.eup %3501  ;;  %3521 = vpow2.f32 %v2935_v38  ;;  %v2145_v41 = vadd.f32 %v2144_v51, %v4415_v8  ;;  %v2146_v53 = vpop.f32.mrb[18].mxu0  ;;  %v4496_v27 = vadd.f32 %v4447_v55, %v4445_v54  ;;  %v1851_v55 = vld [vmem:[#allocation17] sm:$0xff] }
 0x512   : > { %v3504_v49 = vpop.eup %3503  ;;  %v2394_v23 = vadd.f32 1.0, %v3502_v34  ;;  %3523 = vpow2.f32 %v2951_v5  ;;  %v2334_v13 = vadd.f32 %v2302_v45, %v2143_v50  ;;  %v2567_v56 = vadd.f32 %v2551_v9, %v2219_v39  ;;  %v2148_v57 = vpop.f32.mrb[19].mxu0  ;;  %v2306_v39 = vld [vmem:[#allocation5 + $0xe0] sm:$0xff] }
 0x513   : > { %v4471_v6 = vpop.f32.mrb[12].mxu1  ;;  %v3506_v21 = vpop.eup %3505  ;;  %v2506_v58 = vadd.f32 1.0, %v3504_v49  ;;  %3525 = vtanh.f32 %v2566_v48  ;;  %v2446_v7 = vadd.f32 %v2303_v4, %v2145_v41  ;;  %v2147_v11 = vadd.f32 %v2146_v53, %v4412_v44 }
 0x514   : > { %v4473_v60 = vpop.f32.mrb[13].mxu1  ;;  %v3508_v61 = vpop.eup %3507  ;;  %3527 = vrcp.f32 %v2394_v23  ;;  %v2395_v62 = vadd.f32 1.0, %v3506_v21  ;;  %v2936_v63 = vmul.f32 -1.442695, %v2334_v13  ;;  %v2149_v31 = vadd.f32 %v2148_v57, %v4415_v8  ;;  %v2311_v23 = vld [vmem:[#allocation5 + $0x108] sm:$0xff]  ;;  %v2309_v57 = vld [vmem:[#allocation5 + $0xf8] sm:$0xff] }
 0x515   : > { %v4477_v0 = vpop.f32.mrb[14].mxu1  ;;  %v3510_v1 = vpop.eup %3509  ;;  %3529 = vrcp.f32 %v2506_v58  ;;  %v2507_v2 = vadd.f32 1.0, %v3508_v61  ;;  %v2952_v47 = vmul.f32 -1.442695, %v2446_v7  ;;  %v2335_v10 = vadd.f32 %v2305_v12, %v2147_v11  ;;  %v2292_v58 = vld [vmem:[#allocation5 + $0x70] sm:$0xff] }
 0x516   : > { %v4480_v14 = vpop.f32.mrb[15].mxu1  ;;  %v4482_v15 = vpop.eup %3511  ;;  %3531 = vrcp.f32 %v2395_v62  ;;  %v2552_v18 = vmul.f32 %v3510_v1, %v2286_v59  ;;  %v2598_v48 = vsub.f32 1.0, %v4463_v36  ;;  %v2447_v4 = vadd.f32 %v2306_v39, %v2149_v31 }
 0x517   : > { %v3514_v22 = vpop.eup %3513  ;;  %3533 = vrcp.f32 %v2507_v2  ;;  %v2152_v24 = vpop.f32.mrb[20].mxu0  ;;  %v2630_v61 = vmul.f32 %v4463_v36, %v1851_v55  ;;  %v2631_v62 = vmul.f32 %v4467_v46, %v1852_v43  ;;  %v2600_v55 = vsub.f32 1.0, %v4482_v15 }
 0x518   : > { %v4498_v28 = vpop.eup %3515  ;;  %v2568_v30 = vadd.f32 %v2552_v18, %v2224_v42  ;;  %v2553_v19 = vmul.f32 %v3514_v22, %v2289_v3  ;;  %3535 = vpow2.f32 %v2936_v63  ;;  %v2154_v33 = vpop.f32.mrb[21].mxu0  ;;  %v2153_v52 = vadd.f32 %v2152_v24, %v4412_v44  ;;  %v2312_v63 = vld [vmem:[#allocation5 + $0x110] sm:$0xff]  ;;  %v2295_v24 = vld [vmem:[#allocation5 + $0x88] sm:$0xff] }
 0x519   : > { %v3518_v38 = vpop.eup %3517  ;;  %3537 = vtanh.f32 %v2567_v56  ;;  %v2156_v40 = vpop.f32.mrb[22].mxu0  ;;  %v2155_v53 = vadd.f32 %v2154_v33, %v4415_v8  ;;  %v2937_v42 = vmul.f32 -1.442695, %v2335_v10 }
 0x51a   : > { %v3520_v5 = vpop.eup %3519  ;;  %v2396_v45 = vadd.f32 1.0, %v3518_v38  ;;  %3539 = vtanh.f32 %v2568_v30  ;;  %v2569_v50 = vadd.f32 %v2553_v19, %v2227_v20  ;;  %v2158_v9 = vpop.f32.mrb[23].mxu0  ;;  %v2336_v41 = vadd.f32 %v2308_v32, %v2153_v52  ;;  %v2314_v32 = vld [vmem:[#allocation5 + $0x120] sm:$0xff] }
 0x51b   : > { %v3522_v51 = vpop.eup %3521  ;;  %v2508_v34 = vadd.f32 1.0, %v3520_v5  ;;  %v2157_v49 = vadd.f32 %v2156_v40, %v4412_v44  ;;  %v2159_v21 = vadd.f32 %v2158_v9, %v4415_v8  ;;  %v2448_v20 = vadd.f32 %v2309_v57, %v2155_v53  ;;  %v1853_v5 = vld [vmem:[#allocation17 + $0x10] sm:$0xff]  ;;  %v2298_v53 = vld [vmem:[#allocation5 + $0xa0] sm:$0xff] }
 0x51c   : > { %v3524_v13 = vpop.eup %3523  ;;  %3541 = vrcp.f32 %v2396_v45  ;;  %v2397_v56 = vadd.f32 1.0, %v3522_v51  ;;  %v2938_v18 = vmul.f32 -1.442695, %v2336_v41  ;;  %v2953_v19 = vmul.f32 -1.442695, %v2447_v4 }
 0x51d   : > { %v3526_v59 = vpop.eup %3525  ;;  %3543 = vpow2.f32 %v2952_v47  ;;  %v2509_v2 = vadd.f32 1.0, %v3524_v13  ;;  %v2337_v7 = vadd.f32 %v2311_v23, %v2157_v49  ;;  %v2449_v31 = vadd.f32 %v2312_v63, %v2159_v21  ;;  %v2301_v21 = vld [vmem:[#allocation5 + $0xb8] sm:$0xff] }
 0x51e   : > { %v3528_v1 = vpop.eup %3527  ;;  %3545 = vrcp.f32 %v2397_v56  ;;  %v2614_v3 = vmul.f32 %v3526_v59, %v2598_v48  ;;  %v2599_v47 = vsub.f32 1.0, %v4467_v46  ;;  %v2954_v46 = vmul.f32 -1.442695, %v2448_v20 }
 0x51f   : > { %v4508_v11 = vpop.eup %3529  ;;  %3547 = vrcp.f32 %v2508_v34  ;;  %v2554_v12 = vmul.f32 %v3528_v1, %v2292_v58  ;;  %v2162_v22 = vpop.f32.mrb[24].mxu0  ;;  %v2939_v43 = vmul.f32 -1.442695, %v2337_v7  ;;  %v2955_v41 = vmul.f32 -1.442695, %v2449_v31  ;;  %v2315_v1 = vld [vmem:[#allocation5 + $0x128] sm:$0xff] }
 0x520   : > { %v3532_v30 = vpop.eup %3531  ;;  %v4510_v36 = vadd.f32 %v2630_v61, %v2614_v3  ;;  %3549 = vtanh.f32 %v2569_v50  ;;  %v2164_v33 = vpop.f32.mrb[25].mxu0  ;;  %v2163_v39 = vadd.f32 %v2162_v22, %v4412_v44  ;;  %v2632_v23 = vmul.f32 %v4482_v15, %v1853_v5 }
 0x521   : > { %v4512_v38 = vpop.eup %3533  ;;  %3551 = vpow2.f32 %v2937_v42  ;;  %v2570_v10 = vadd.f32 %v2554_v12, %v4492_v16  ;;  %v2166_v52 = vpop.f32.mrb[26].mxu0  ;;  %v2555_v45 = vmul.f32 %v3532_v30, %v2295_v24  ;;  %v2243_v56 = vadd.f32 %v4442_v37, %v4445_v54  ;;  %v1854_v42 = vld [vmem:[#allocation17 + $0x18] sm:$0xff] }
 0x522   : > { %v3536_v40 = vpop.eup %3535  ;;  %3553 = vrcp.f32 %v2509_v2  ;;  %2662 = vst [vmem:[#allocation17] sm:$0xff] %v4510_v36  ;;  %v4519_v48 = vpop.f32.mrb[27].mxu0  ;;  %v2338_v51 = vadd.f32 %v2314_v32, %v2163_v39  ;;  %v2165_v59 = vadd.f32 %v2164_v33, %v4415_v8  ;;  %v4530_v2 = vadd.f32 %v4454_v17, %v4445_v54  ;;  %v2317_v32 = vld [vmem:[#allocation5 + $0x138] sm:$0xff] }
 0x523   : > { %v3538_v50 = vpop.eup %3537  ;;  %v2398_v9 = vadd.f32 1.0, %v3536_v40  ;;  %3555 = vpow2.f32 %v2938_v18  ;;  %v2571_v49 = vadd.f32 %v2555_v45, %v4496_v27  ;;  %v4536_v18 = vadd.f32 %v4457_v26, %v4445_v54 }
 0x524   : > { %v3540_v16 = vpop.eup %3539  ;;  %v2615_v34 = vmul.f32 %v3538_v50, %v2599_v47  ;;  %3557 = vpow2.f32 %v2953_v19  ;;  %v2940_v58 = vmul.f32 -1.442695, %v2338_v51  ;;  %v2167_v22 = vadd.f32 %v2166_v52, %v4412_v44  ;;  %v1855_v19 = vld [vmem:[#allocation17 + $0x20] sm:$0xff] }
 0x525   : > { %v2616_v13 = vmul.f32 %v3540_v16, %v2600_v55  ;;  %3559 = vrcp.f32 %v2398_v9  ;;  %v2450_v26 = vadd.f32 %v2315_v1, %v2165_v59  ;;  %v2320_v9 = vld [vmem:[#allocation5 + $0x150] sm:$0xff]  ;;  %v2602_v16 = vsub.f32 1.0, %v4508_v11 }
 0x526   : > { %v3542_v4 = vpop.eup %3541  ;;  %v2647_v57 = vadd.f32 %v2631_v62, %v2615_v34  ;;  %3561 = vpow2.f32 %v2939_v43  ;;  %v2601_v62 = vsub.f32 1.0, %v4498_v28  ;;  %v2634_v43 = vmul.f32 %v4508_v11, %v1855_v19  ;;  %v1858_v19 = vld [vmem:[#allocation17 + $0x38] sm:$0xff] }
 0x527   : > { %v3544_v61 = vpop.eup %3543  ;;  %v4526_v63 = vadd.f32 %v2632_v23, %v2616_v13  ;;  %3563 = vpow2.f32 %v2954_v46  ;;  %v2556_v27 = vmul.f32 %v3542_v4, %v2298_v53  ;;  %v2172_v15 = vpop.f32.mrb[28].mxu0  ;;  %v2339_v50 = vadd.f32 %v2317_v32, %v2167_v22 }
 0x528   : > { %v3546_v37 = vpop.eup %3545  ;;  %2663 = vst [vmem:[#allocation17 + $0x8] sm:$0xff] %v2647_v57  ;;  %v2678_v3 = vpack.c.bf16 %v2647_v57, %v4510_v36  ;;  %3565 = vpow2.f32 %v2955_v41  ;;  %v2174_v7 = vpop.f32.mrb[29].mxu0  ;;  %v2633_v36 = vmul.f32 %v4498_v28, %v1854_v42  ;;  %v2510_v31 = vadd.f32 1.0, %v3544_v61  ;;  %v2304_v41 = vld [vmem:[#allocation5 + $0xd0] sm:$0xff]  ;;  %v2318_v57 = vld [vmem:[#allocation5 + $0x140] sm:$0xff] }
 0x529   : > { %v4538_v20 = vpop.eup %3547  ;;  %2664 = vst [vmem:[#allocation17 + $0x10] sm:$0xff] %v4526_v63  ;;  %v2572_v12 = vadd.f32 %v2556_v27, %v4488_v25  ;;  %3567 = vtanh.f32 %v2570_v10  ;;  %v2557_v17 = vmul.f32 %v3546_v37, %v2301_v21  ;;  %v2176_v24 = vpop.f32.mrb[30].mxu0  ;;  %v2173_v25 = vadd.f32 %v2172_v15, %v4412_v44 }
 0x52a   : > { %v3550_v30 = vpop.eup %3549  ;;  %2686 = vst [vmem:[#allocation3] sm:$0xff] %v2678_v3  ;;  %3569 = vpow2.f32 %v2940_v58  ;;  %v2178_v33 = vpop.f32.mrb[31].mxu0  ;;  %v2175_v5 = vadd.f32 %v2174_v7, %v4415_v8  ;;  %v4550_v28 = vadd.f32 %v4461_v35, %v4445_v54  ;;  %v2956_v34 = vmul.f32 -1.442695, %v2450_v26 }
 0x52b   : > { %v3552_v47 = vpop.eup %3551  ;;  %v2617_v39 = vmul.f32 %v3550_v30, %v2601_v62  ;;  %3571 = vtanh.f32 %v2572_v12  ;;  %v2573_v40 = vadd.f32 %v2557_v17, %v2243_v56  ;;  %v2603_v23 = vsub.f32 1.0, %v4512_v38  ;;  %v2323_v56 = vld [vmem:[#allocation5 + $0x168] sm:$0xff] }
 0x52c   : > { %v4545_v10 = vpop.eup %3553  ;;  %v2399_v52 = vadd.f32 1.0, %v3552_v47  ;;  %3573 = vtanh.f32 %v2571_v49  ;;  %v1857_v49 = vld [vmem:[#allocation17 + $0x30] sm:$0xff]  ;;  %v2169_v13 = vadd.f32 %v4519_v48, %v4415_v8  ;;  %v2340_v21 = vadd.f32 %v2320_v9, %v2173_v25  ;;  %v1856_v17 = vld [vmem:[#allocation17 + $0x28] sm:$0xff] }
 0x52d   : > { %v3556_v55 = vpop.eup %3555  ;;  %v2649_v45 = vadd.f32 %v2633_v36, %v2617_v39  ;;  %3575 = vtanh.f32 %v2573_v40  ;;  %v2177_v11 = vadd.f32 %v2176_v24, %v4412_v44  ;;  %v2179_v58 = vadd.f32 %v2178_v33, %v4415_v8  ;;  %v2324_v39 = vld [vmem:[#allocation5 + $0x170] sm:$0xff]  ;;  %v2307_v40 = vld [vmem:[#allocation5 + $0xe8] sm:$0xff] }
 0x52e   : > { %v3558_v46 = vpop.eup %3557  ;;  %3577 = vrcp.f32 %v2399_v52  ;;  %v2400_v51 = vadd.f32 1.0, %v3556_v55  ;;  %v2941_v42 = vmul.f32 -1.442695, %v2339_v50  ;;  %v4562_v1 = vadd.f32 %v4471_v6, %v4445_v54 }
 0x52f   : > { %v3560_v53 = vpop.eup %3559  ;;  %2665 = vst [vmem:[#allocation17 + $0x18] sm:$0xff] %v2649_v45  ;;  %v2679_v35 = vpack.c.bf16 %v2649_v45, %v4526_v63  ;;  %3579 = vrcp.f32 %v2510_v31  ;;  %v2321_v63 = vld [vmem:[#allocation5 + $0x158] sm:$0xff]  ;;  %v2636_v15 = vmul.f32 %v4538_v20, %v1857_v49  ;;  %v2511_v37 = vadd.f32 1.0, %v3558_v46  ;;  %v2310_v46 = vld [vmem:[#allocation5 + $0x100] sm:$0xff] }
 0x530   : > { %v3562_v4 = vpop.eup %3561  ;;  %3581 = vrcp.f32 %v2400_v51  ;;  %v2558_v27 = vmul.f32 %v3560_v53, %v2304_v41  ;;  %v2341_v62 = vadd.f32 %v2323_v56, %v2177_v11  ;;  %v2604_v44 = vsub.f32 1.0, %v4538_v20 }
 0x531   : > { %v3564_v59 = vpop.eup %3563  ;;  %2687 = vst [vmem:[#allocation3 + $0x8] sm:$0xff] %v2679_v35  ;;  %v2401_v61 = vadd.f32 1.0, %v3562_v4  ;;  %3583 = vpow2.f32 %v2956_v34  ;;  %v2451_v8 = vadd.f32 %v2318_v57, %v2169_v13  ;;  %v2605_v24 = vsub.f32 1.0, %v4545_v10 }
 0x532   : > { %v3566_v48 = vpop.eup %3565  ;;  %v2574_v7 = vadd.f32 %v2558_v27, %v4536_v18  ;;  %v2942_v6 = vmul.f32 -1.442695, %v2340_v21  ;;  %v2452_v30 = vadd.f32 %v2321_v63, %v2175_v5  ;;  %v2512_v31 = vadd.f32 1.0, %v3564_v59 }
 0x533   : > { %v3568_v3 = vpop.eup %3567  ;;  %3585 = vrcp.f32 %v2401_v61  ;;  %v4570_v32 = vadd.f32 %v4477_v0, %v4445_v54  ;;  %v2943_v47 = vmul.f32 -1.442695, %v2341_v62  ;;  %v2635_v52 = vmul.f32 %v4512_v38, %v1856_v17  ;;  %v1860_v17 = vld [vmem:[#allocation17 + $0x48] sm:$0xff] }
 0x534   : > { %v3570_v12 = vpop.eup %3569  ;;  %v2618_v22 = vmul.f32 %v3568_v3, %v2602_v16  ;;  %3587 = vpow2.f32 %v2941_v42  ;;  %v2957_v55 = vmul.f32 -1.442695, %v2451_v8  ;;  %v2637_v50 = vmul.f32 %v4545_v10, %v1858_v19  ;;  %v1859_v8 = vld [vmem:[#allocation17 + $0x40] sm:$0xff] }
 0x535   : > { %v3572_v36 = vpop.eup %3571  ;;  %v2402_v26 = vadd.f32 1.0, %v3570_v12  ;;  %3589 = vrcp.f32 %v2511_v37  ;;  %v2453_v16 = vadd.f32 %v2324_v39, %v2179_v58  ;;  %v2513_v53 = vadd.f32 1.0, %v3566_v48 }
 0x536   : > { %v3574_v20 = vpop.eup %3573  ;;  %v2620_v33 = vmul.f32 %v3572_v36, %v2604_v44  ;;  %v2650_v18 = vadd.f32 %v2634_v43, %v2618_v22  ;;  %v2958_v49 = vmul.f32 -1.442695, %v2452_v30  ;;  %v2259_v57 = vadd.f32 %v4459_v29, %v4445_v54 }
 0x537   : > { %v3576_v25 = vpop.eup %3575  ;;  %3591 = vrcp.f32 %v2402_v26  ;;  %v2619_v5 = vmul.f32 %v3574_v20, %v2603_v23  ;;  %v2313_v23 = vld [vmem:[#allocation5 + $0x118] sm:$0xff]  ;;  %v2959_v11 = vmul.f32 -1.442695, %v2453_v16  ;;  %v2264_v29 = vadd.f32 %v4473_v60, %v4445_v54  ;;  %v1861_v20 = vld [vmem:[#allocation17 + $0x50] sm:$0xff] }
 0x538   : > { %v3578_v45 = vpop.eup %3577  ;;  %v2652_v9 = vadd.f32 %v2636_v15, %v2620_v33  ;;  %2666 = vst [vmem:[#allocation17 + $0x20] sm:$0xff] %v2650_v18  ;;  %v2621_v0 = vmul.f32 %v3576_v25, %v2605_v24  ;;  %3593 = vpow2.f32 %v2942_v6 }
 0x539   : > { %v3580_v51 = vpop.eup %3579  ;;  %3595 = vrcp.f32 %v2512_v31  ;;  %v2651_v43 = vadd.f32 %v2635_v52, %v2619_v5  ;;  %v2559_v34 = vmul.f32 %v3578_v45, %v2307_v40  ;;  %v2319_v5 = vld [vmem:[#allocation5 + $0x148] sm:$0xff] }
 0x53a   : > { %v3582_v41 = vpop.eup %3581  ;;  %2668 = vst [vmem:[#allocation17 + $0x30] sm:$0xff] %v2652_v9  ;;  %v2653_v38 = vadd.f32 %v2637_v50, %v2621_v0  ;;  %3597 = vpow2.f32 %v2943_v47  ;;  %v2606_v24 = vsub.f32 1.0, %v3580_v51  ;;  %v2638_v36 = vmul.f32 %v3580_v51, %v1859_v8 }
 0x53b   : > { %2667 = vst [vmem:[#allocation17 + $0x28] sm:$0xff] %v2651_v43  ;;  %v2680_v35 = vpack.c.bf16 %v2651_v43, %v2650_v18  ;;  %3599 = vpow2.f32 %v2957_v55  ;;  %v2560_v10 = vmul.f32 %v3582_v41, %v2310_v46  ;;  %v2575_v13 = vadd.f32 %v2559_v34, %v4550_v28  ;;  %v3584_v56 = vpop.eup %3583  ;;  %v2316_v28 = vld [vmem:[#allocation5 + $0x130] sm:$0xff]  ;;  %v1862_v46 = vld [vmem:[#allocation17 + $0x58] sm:$0xff] }
 0x53c   : > { %2669 = vst [vmem:[#allocation17 + $0x38] sm:$0xff] %v2653_v38  ;;  %v2681_v4 = vpack.c.bf16 %v2653_v38, %v2652_v9  ;;  %3601 = vtanh.f32 %v2574_v7  ;;  %v2514_v42 = vadd.f32 1.0, %v3584_v56  ;;  %v2267_v9 = vadd.f32 %v4480_v14, %v4445_v54  ;;  %v2325_v56 = vld [vmem:[#allocation5 + $0x178] sm:$0xff] }
 0x53d   : > { %v3586_v21 = vpop.eup %3585  ;;  %2688 = vst [vmem:[#allocation3 + $0x10] sm:$0xff] %v2680_v35  ;;  %v2576_v58 = vadd.f32 %v2560_v10, %v4530_v2  ;;  %3603 = vtanh.f32 %v2575_v13 }
 0x53e   : > { %3605 = vrcp.f32 %v2513_v53  ;;  %2689 = vst [vmem:[#allocation3 + $0x18] sm:$0xff] %v2681_v4  ;;  %v2561_v59 = vmul.f32 %v3586_v21, %v2313_v23  ;;  %v3588_v61 = vpop.eup %3587  ;;  %v2322_v53 = vld [vmem:[#allocation5 + $0x160] sm:$0xff] }
 0x53f   : > { %3607 = vpow2.f32 %v2958_v49  ;;  %v3590_v63 = vpop.eup %3589  ;;  %v2403_v27 = vadd.f32 1.0, %v3588_v61 }
 0x540   : > { %3609 = vtanh.f32 %v2576_v58  ;;  %v2577_v48 = vadd.f32 %v2561_v59, %v2259_v57  ;;  %v2607_v30 = vsub.f32 1.0, %v3590_v63  ;;  %v2639_v26 = vmul.f32 %v3590_v63, %v1860_v17  ;;  %v1863_v57 = vld [vmem:[#allocation17 + $0x60] sm:$0xff]  ;;  %v1866_v17 = vld [vmem:[#allocation17 + $0x78] sm:$0xff] }
 0x541   : > { %v3592_v15 = vpop.eup %3591  ;;  %3611 = vpow2.f32 %v2959_v11 }
 0x542   : > { %v3594_v37 = vpop.eup %3593  ;;  %3613 = vrcp.f32 %v2403_v27  ;;  %v2562_v2 = vmul.f32 %v3592_v15, %v2316_v28  ;;  %v1864_v15 = vld [vmem:[#allocation17 + $0x68] sm:$0xff] }
 0x543   : > { %v3596_v62 = vpop.eup %3595  ;;  %3615 = vrcp.f32 %v2514_v42  ;;  %v2404_v3 = vadd.f32 1.0, %v3594_v37 }
 0x544   : > { %v3598_v44 = vpop.eup %3597  ;;  %3617 = vtanh.f32 %v2577_v48  ;;  %v2578_v7 = vadd.f32 %v2562_v2, %v2264_v29  ;;  %v2608_v39 = vsub.f32 1.0, %v3596_v62  ;;  %v2640_v45 = vmul.f32 %v3596_v62, %v1861_v20 }
 0x545   : > { %v3600_v12 = vpop.eup %3599  ;;  %3619 = vrcp.f32 %v2404_v3  ;;  %v2405_v22 = vadd.f32 1.0, %v3598_v44  ;;  %v1865_v44 = vld [vmem:[#allocation17 + $0x70] sm:$0xff] }
 0x546   : > { %v3602_v6 = vpop.eup %3601  ;;  %v2515_v47 = vadd.f32 1.0, %v3600_v12 }
 0x547   : > { %v3604_v60 = vpop.eup %3603  ;;  %3621 = vrcp.f32 %v2405_v22  ;;  %v2622_v19 = vmul.f32 %v3602_v6, %v2606_v24 }
 0x548   : > { %v3606_v31 = vpop.eup %3605  ;;  %v2623_v33 = vmul.f32 %v3604_v60, %v2607_v30  ;;  %3623 = vtanh.f32 %v2578_v7 }
 0x549   : > { %v3608_v18 = vpop.eup %3607  ;;  %v2654_v40 = vadd.f32 %v2638_v36, %v2622_v19  ;;  %3625 = vrcp.f32 %v2515_v47  ;;  %v2609_v41 = vsub.f32 1.0, %v3606_v31  ;;  %v2641_v23 = vmul.f32 %v3606_v31, %v1862_v46 }
 0x54a   : > { %v3610_v25 = vpop.eup %3609  ;;  %v2655_v52 = vadd.f32 %v2639_v26, %v2623_v33  ;;  %v2516_v51 = vadd.f32 1.0, %v3608_v18 }
 0x54b   : > { %v3612_v55 = vpop.eup %3611  ;;  %v2624_v50 = vmul.f32 %v3610_v25, %v2608_v39  ;;  %2670 = vst [vmem:[#allocation17 + $0x40] sm:$0xff] %v2654_v40 }
 0x54c   : > { %v3614_v0 = vpop.eup %3613  ;;  %2671 = vst [vmem:[#allocation17 + $0x48] sm:$0xff] %v2655_v52  ;;  %v2682_v43 = vpack.c.bf16 %v2655_v52, %v2654_v40  ;;  %v2517_v35 = vadd.f32 1.0, %v3612_v55  ;;  %3627 = vrcp.f32 %v2516_v51 }
 0x54d   : > { %v3616_v16 = vpop.eup %3615  ;;  %v2656_v34 = vadd.f32 %v2640_v45, %v2624_v50  ;;  %v2563_v38 = vmul.f32 %v3614_v0, %v2319_v5 }
 0x54e   : > { %v3618_v49 = vpop.eup %3617  ;;  %2690 = vst [vmem:[#allocation3 + $0x20] sm:$0xff] %v2682_v43  ;;  %v2610_v58 = vsub.f32 1.0, %v3616_v16  ;;  %v2642_v28 = vmul.f32 %v3616_v16, %v1863_v57 }
 0x54f   : > { %v3620_v10 = vpop.eup %3619  ;;  %2672 = vst [vmem:[#allocation17 + $0x50] sm:$0xff] %v2656_v34  ;;  %v2625_v13 = vmul.f32 %v3618_v49, %v2609_v41  ;;  %v2579_v54 = vadd.f32 %v2563_v38, %v2267_v9 }
 0x550   : > { %v2564_v14 = vmul.f32 %v3620_v10, %v2322_v53 }
 0x551   : > { %v3622_v4 = vpop.eup %3621  ;;  %v2657_v21 = vadd.f32 %v2641_v23, %v2625_v13  ;;  %3629 = vtanh.f32 %v2579_v54 }
 0x552   : > { %3631 = vrcp.f32 %v2517_v35  ;;  %v2580_v11 = vadd.f32 %v2564_v14, %v4562_v1  ;;  %v2565_v59 = vmul.f32 %v3622_v4, %v2325_v56  ;;  %v3624_v61 = vpop.eup %3623 }
 0x553   : > { %2673 = vst [vmem:[#allocation17 + $0x58] sm:$0xff] %v2657_v21  ;;  %v2683_v42 = vpack.c.bf16 %v2657_v21, %v2656_v34  ;;  %v2626_v63 = vmul.f32 %v3624_v61, %v2610_v58  ;;  %v3626_v29 = vpop.eup %3625 }
 0x554   : > { %3633 = vtanh.f32 %v2580_v11  ;;  %v2581_v27 = vadd.f32 %v2565_v59, %v4570_v32  ;;  %v2611_v2 = vsub.f32 1.0, %v3626_v29  ;;  %v2643_v3 = vmul.f32 %v3626_v29, %v1864_v15 }
 0x555   : > { %2691 = vst [vmem:[#allocation3 + $0x28] sm:$0xff] %v2683_v42  ;;  %v2658_v48 = vadd.f32 %v2642_v28, %v2626_v63 }
 0x556   : > { %3635 = vtanh.f32 %v2581_v27  ;;  %v3628_v37 = vpop.eup %3627 }
 0x557   : > { %2674 = vst [vmem:[#allocation17 + $0x60] sm:$0xff] %v2658_v48  ;;  %v2612_v7 = vsub.f32 1.0, %v3628_v37  ;;  %v2644_v24 = vmul.f32 %v3628_v37, %v1865_v44 }
 0x55b   : > { %v3630_v62 = vpop.eup %3629 }
 0x55c   : > { %v3632_v1 = vpop.eup %3631  ;;  %v2627_v8 = vmul.f32 %v3630_v62, %v2611_v2 }
 0x55d   : > { %v2613_v32 = vsub.f32 1.0, %v3632_v1  ;;  %v2645_v36 = vmul.f32 %v3632_v1, %v1866_v17 }
 0x55e   : > { %v3634_v12 = vpop.eup %3633  ;;  %v2659_v22 = vadd.f32 %v2643_v3, %v2627_v8 }
 0x55f   : > { %v2628_v6 = vmul.f32 %v3634_v12, %v2612_v7 }
 0x560   : > { %v3636_v30 = vpop.eup %3635  ;;  %2675 = vst [vmem:[#allocation17 + $0x68] sm:$0xff] %v2659_v22  ;;  %v2684_v60 = vpack.c.bf16 %v2659_v22, %v2658_v48 }
 0x561   : > { %v2660_v19 = vadd.f32 %v2644_v24, %v2628_v6  ;;  %v2629_v31 = vmul.f32 %v3636_v30, %v2613_v32 }
 0x562   : > { %2692 = vst [vmem:[#allocation3 + $0x30] sm:$0xff] %v2684_v60 }
 0x563   : > { %2676 = vst [vmem:[#allocation17 + $0x70] sm:$0xff] %v2660_v19  ;;  %v2661_v26 = vadd.f32 %v2645_v36, %v2629_v31 }
 0x565   : > { %2677 = vst [vmem:[#allocation17 + $0x78] sm:$0xff] %v2661_v26  ;;  %v2685_v20 = vpack.c.bf16 %v2661_v26, %v2660_v19 }
 0x567   : > { %2693 = vst [vmem:[#allocation3 + $0x38] sm:$0xff] %v2685_v20 }
 0x568 PF: > { %s4673_s12 = sld [smem:[#allocation23_spill]]  ;;  %s3904_s28 = smov [#allocation17]  }
 0x569   : > { %s2700_s21 = sshll.u32 %s3904_s28, 4  ;;  %s2701_s21 = int_to_ptr.vmem [resolvable:$true] %s2700_s21 }
 0x56a   : > { %s3805_s18 = scalar_lea.vmem %s2701_s21, 2048  ;;  %p3812_p1 = scmp.lt.s32.totalorder %s2701_s21, %s2701_s21 }
 0x56b   : > { %p3806_p12 = scmp.ne.s32.totalorder %s2701_s21, %s3805_s18  ;;  %p3813_p4 = scmp.lt.s32.totalorder %s3805_s18, %s3805_s18 }
 0x56d   : > { %p3814_p2 = por %p3813_p4, %p3812_p1 }
 0x56e   : > { %s4674_s24 = sadd.s32 4294967295, %s4673_s12  }
 0x56f   : > { %p4586_p11 = scmp.eq.s32.totalorder %s4674_s24, 5 }
 0x571   : > { %p3807_p13 = pnand %p3806_p12, %p4586_p11 }
 0x573   : > { %p3808_p0 = pneg %p3807_p13 }
 0x575   : > { %p3815_p6 = pnand %p3814_p2, %p3808_p0 }
 0x577   : > { %3818 = shalt.err (!%p3815_p6)
}
 0x578   : > { %s4676_s14 = sld [smem:[#allocation28_spill]] }
 0x57e   : > { %s4677_s19 = smov %s4676_s14  ;;  %s3819_s20 = scalar_lea.hbm %s4676_s14, 2048 }
 0x57f   : > { %p3820_p3 = scmp.ne.s32.totalorder %s4677_s19, %s3819_s20  ;;  %p3825_p8 = scmp.lt.u32.totalorder %s3819_s20, %s4677_s19 }
 0x581   : > { %p3821_p7 = pnand %p3820_p3, %p4586_p11 }
 0x583   : > { %p3822_p5 = pneg %p3821_p7 }
 0x585   : > { %p3827_p9 = pnand %p3825_p8, %p3822_p5 }
 0x587   : > { %3830 = shalt.err (!%p3827_p9)
}
 0x588   : > { %s3905_s8 = smov 128   ;;  %s3906_s0 = smov 8  }
 0x589   : > { %3265 = dma.vmem_to_hbm [thread:$0]  (%p4586_p11), %s2701_s21, 2048, %s4677_s19, [#allocation8], %s3905_s8, %s3905_s8, %s3906_s0  }
 0x58a   : > { %3868 = dma.done.wait (%p4586_p11), [#allocation8], 2048  }
 0x58b   : > { %3870 = vsyncadd (%p4586_p11), [#allocation8], 4294965248 }
 0x58c PF: > { %s4678_s26 = sld [smem:[#allocation23_spill]]  ;;  %s4679_s13 = smov %s3881_s15 }
 0x58d   : > { %s4680_s14 = smov %s3885_s16  ;;  %s4681_s15 = smov %s4684_s29 }
 0x58e   : > { %s4682_s16 = smov %s4688_s30 }
 0x592   : > { %s25_s17 = sadd.s32 1, %s4678_s26  }
 0x593   : > { %p22_p10 = scmp.ge.s32.totalorder %s25_s17, 8  }
 0x595   :  { %24 = sbr.rel (!%p22_p10) target bundleno = 13 (0xd), region = 125 }
 0x59c   :  { %2716 = vsyncpa [#allocation7], 1 }
 0x59d   :  { %2718 = vsyncpa [#allocation7 + $0x1], 1 }
 0x59e   :  { %2719 = vsyncpa [#allocation10], 1 }
 0x59f   :  { %2720 = vsyncpa [#allocation13], 1 }
 0x5a0   :  { %2721 = vsyncpa [#allocation16], 1 }
 0x5a1   :  { %2722 = vsyncpa [#allocation8], 1 }
 0x5a2   :  { %2724 = vsyncpa [#allocation8 + $0x1], 1 }

</bundles_post_ra>
